<compile_context>
chip_gen: v7x
topology: tpu7x:2x2x1
jax: 0.10.0
libtpu: 0.0.40
codegen_flags: <defaults>
</compile_context>

<pallas_src>
import functools

import jax
import jax.numpy as jnp
from jax import lax
from jax.experimental import pallas as pl
from jax.experimental.pallas import tpu as pltpu


# --------------------------------------------------------------------------- #
# Fused whole-network kernel
# --------------------------------------------------------------------------- #
def _discriminator_kernel(x2col_ref, w1bd_ref, w2_ref, w3_ref, par_ref, o_ref,
                          y3in_ref, *, n_batch):
    f32 = jnp.float32
    m2 = x2col_ref.shape[0]                 # 25 * N rows, ordered (oh2, ow2, n)
    par = par_ref[...]                      # (8, 128) packed channel params

    # ---- Layer 1: Conv2d(nc, 8, k=4, s=2) + bias + LeakyReLU(0.2) ---------- #
    # x2col @ block_diag(w1) directly yields the layer-2 patch matrix with
    # lanes (i2, j2, cout1): 16*8 = 128 lanes -> fully lane-dense MXU output.
    p2 = jnp.dot(x2col_ref[...], w1bd_ref[...], preferred_element_type=f32)
    p2 = p2 + par[0:1, :]                   # b1 tiled 16x -> (1, 128)
    p2 = jnp.where(p2 > 0, p2, 0.2 * p2)

    # ---- Layer 2: Conv2d(8, 16, k=4, s=2) + bias + BN(train) + LReLU ------- #
    y2 = jnp.dot(p2.astype(jnp.bfloat16), w2_ref[...], preferred_element_type=f32)
    y2 = y2 + par[1:2, 0:16]
    inv_m = 1.0 / m2                        # rows == the (N, H, W) axes of BN2
    mean2 = jnp.sum(y2, axis=0, keepdims=True) * inv_m
    var2 = jnp.maximum(
        jnp.sum(y2 * y2, axis=0, keepdims=True) * inv_m - mean2 * mean2, 0.0)
    scale2 = par[2:3, 0:16] * lax.rsqrt(var2 + 1e-5)    # gamma folded in
    shift2 = par[3:4, 0:16] - mean2 * scale2            # beta folded in
    y2 = y2 * scale2 + shift2
    y2 = jnp.where(y2 > 0, y2, 0.2 * y2)

    # ---- Layer 3: Conv2d(16, 32, k=4, s=2) on 5x5 -> 1x1, + BN + LReLU ----- #
    # Pack the 16 used spatial positions (rows (i3*5+j3)*N .. +N of y2, since
    # rows are ordered (oh2, ow2, n)) lane-wise into a (N, 256) scratch tile,
    # then hit the MXU ONCE instead of 16 tiny pushes through the result FIFO.
    for i3 in range(4):
        for j3 in range(4):
            r = (i3 * 5 + j3) * n_batch
            c = (i3 * 4 + j3) * 16
            y3in_ref[:, c:c + 16] = y2[r:r + n_batch, :]
    y3 = jnp.dot(y3in_ref[...].astype(jnp.bfloat16), w3_ref[...],
                 preferred_element_type=f32)
    y3 = y3 + par[4:5, 0:32]
    inv_n = 1.0 / n_batch
    mean3 = jnp.sum(y3, axis=0, keepdims=True) * inv_n
    var3 = jnp.maximum(
        jnp.sum(y3 * y3, axis=0, keepdims=True) * inv_n - mean3 * mean3, 0.0)
    scale3 = par[5:6, 0:32] * lax.rsqrt(var3 + 1e-5)
    shift3 = par[6:7, 0:32] - mean3 * scale3
    y3 = y3 * scale3 + shift3
    y3 = jnp.where(y3 > 0, y3, 0.2 * y3)

    # ---- Layer 4: Conv2d(32, 1, k=1) + Sigmoid (EUP exp + approx recip) ---- #
    logits = jnp.sum(y3 * par[7:8, 0:32], axis=1, keepdims=True) + par[7:8, 32:33]
    o_ref[...] = pl.reciprocal(1.0 + jnp.exp(-logits), approx=True).astype(o_ref.dtype)


# --------------------------------------------------------------------------- #
# Host-side operand preparation (tiny, one-time glue — static slices only)
# --------------------------------------------------------------------------- #
def _build_x2col(x):
    """Layer-2-indexed patch matrix of the raw NCHW input.

    Rows: (oh2, ow2, n) over the 5x5 layer-2 output grid.
    Cols: (i2, j2, c, i1, j1) = layer-2 kernel offset x layer-1 patch feature.
    value = x[n, c, 4*oh2 + 2*i2 + i1, 4*ow2 + 2*j2 + j1]
    Shape: (25*N, 16 * C * 16).

    Built from 32 STATIC strided slices + stack/transpose/reshape (no gather).
    """
    n, c, h, w = x.shape
    assert h == 28 and w == 28, "fused Discriminator kernel assumes 28x28 input"
    # Stage A: layer-1 im2col patches at stride 2 -> (i1, j1, n, c, 13, 13)
    pat1 = jnp.stack([x[:, :, i1:i1 + 25:2, j1:j1 + 25:2]
                      for i1 in range(4) for j1 in range(4)], axis=0)
    pat1 = pat1.reshape(4, 4, n, c, 13, 13)
    # Stage B: layer-2 windows over those patches -> (i2, j2, i1, j1, n, c, 5, 5)
    pat2 = jnp.stack([pat1[:, :, :, :, i2:i2 + 9:2, j2:j2 + 9:2]
                      for i2 in range(4) for j2 in range(4)], axis=0)
    pat2 = pat2.reshape(4, 4, 4, 4, n, c, 5, 5)
    # -> (oh2, ow2, n, i2, j2, c, i1, j1), then flatten rows / cols.
    pat2 = pat2.transpose(6, 7, 4, 0, 1, 5, 2, 3)
    return pat2.reshape(25 * n, 16 * c * 16)


def prepare_operands(p, image_nc):
    """One-time matricisation / packing of the PyTorch-layout parameters."""
    f1 = image_nc * 16
    # conv1 (8, C, 4, 4) OIHW -> (C*16, 8), row order (c, i1, j1); block-diag x16.
    w1m = p["w1"].transpose(1, 2, 3, 0).reshape(f1, 8)
    w1bd = jnp.kron(jnp.eye(16, dtype=jnp.float32), w1m).astype(jnp.bfloat16)
    # conv2 (16, 8, 4, 4) -> (128, 16), row order (i2, j2, cin).
    w2m = p["w2"].transpose(2, 3, 1, 0).reshape(128, 16).astype(jnp.bfloat16)
    # conv3 (32, 16, 4, 4) -> (256, 32), row order (i3, j3, cin); bf16 operand.
    w3m = p["w3"].transpose(2, 3, 1, 0).reshape(256, 32).astype(jnp.bfloat16)
    # All per-channel vectors packed into ONE aligned (8, 128) f32 tile.
    par = jnp.zeros((8, 128), jnp.float32)
    par = par.at[0, :].set(jnp.tile(p["b1"], 16))       # conv1 bias, tiled 16x
    par = par.at[1, 0:16].set(p["b2"])                  # conv2 bias
    par = par.at[2, 0:16].set(p["g2"])                  # bn2 gamma
    par = par.at[3, 0:16].set(p["be2"])                 # bn2 beta
    par = par.at[4, 0:32].set(p["b3"])                  # conv3 bias
    par = par.at[5, 0:32].set(p["g3"])                  # bn3 gamma
    par = par.at[6, 0:32].set(p["be3"])                 # bn3 beta
    par = par.at[7, 0:32].set(p["w4"].reshape(32))      # conv4 (1x1) weight
    par = par.at[7, 32].set(p["b4"][0])                 # conv4 bias
    return {"w1bd": w1bd, "w2m": w2m, "w3m": w3m, "par": par}


def discriminator_forward(x, ops):
    n = x.shape[0]
    x2col = _build_x2col(x).astype(jnp.bfloat16)
    kernel = functools.partial(_discriminator_kernel, n_batch=n)
    out = pl.pallas_call(
        kernel,
        out_shape=jax.ShapeDtypeStruct((n, 1), jnp.float32),
        in_specs=[pl.BlockSpec(memory_space=pltpu.MemorySpace.VMEM)] * 5,
        out_specs=pl.BlockSpec(memory_space=pltpu.MemorySpace.VMEM),
        scratch_shapes=[pltpu.VMEM((n, 256), jnp.float32)],   # layer-3 lane pack
        # Actual footprint is well under 1 MiB at this batch; keep a small,
        # honest limit so a future batch-scaled tiling surfaces real overshoot.
        compiler_params=pltpu.CompilerParams(vmem_limit_bytes=4 * 1024 * 1024),
    )(x2col, ops["w1bd"], ops["w2m"], ops["w3m"], ops["par"])
    return jnp.squeeze(out)       # matches torch .squeeze(): (N,1,1,1) -> (N,)


# --------------------------------------------------------------------------- #
# Pure-JAX reference (for the correctness check only)
# --------------------------------------------------------------------------- #
def ref_forward(x, p):
    def conv(x, w, b, s):
        y = lax.conv_general_dilated(x, w, (s, s), "VALID",
                                     dimension_numbers=("NCHW", "OIHW", "NCHW"))
        return y + b[None, :, None, None]

    def bn(x, g, b):
        m = jnp.mean(x, axis=(0, 2, 3), keepdims=True)
        v = jnp.mean(jnp.square(x - m), axis=(0, 2, 3), keepdims=True)
        return (x - m) / jnp.sqrt(v + 1e-5) * g[None, :, None, None] + b[None, :, None, None]

    lrelu = lambda t: jnp.where(t > 0, t, 0.2 * t)
    y = lrelu(conv(x, p["w1"], p["b1"], 2))
    y = lrelu(bn(conv(y, p["w2"], p["b2"], 2), p["g2"], p["be2"]))
    y = lrelu(bn(conv(y, p["w3"], p["b3"], 2), p["g3"], p["be3"]))
    y = jax.nn.sigmoid(conv(y, p["w4"], p["b4"], 1))
    return jnp.squeeze(y)


# --------------------------------------------------------------------------- #
# Deterministic parameter init (shapes from Discriminator.__init__, image_nc=1)
# --------------------------------------------------------------------------- #
def init_params(key, image_nc):
    ks = jax.random.split(key, 8)

    def cw(k, cout, cin, ksz):
        return 0.1 * jax.random.normal(k, (cout, cin, ksz, ksz), jnp.float32)

    p = {}
    p["w1"] = cw(ks[0], 8, image_nc, 4);  p["b1"] = 0.1 * jax.random.normal(ks[1], (8,), jnp.float32)
    p["w2"] = cw(ks[2], 16, 8, 4);        p["b2"] = 0.1 * jax.random.normal(ks[3], (16,), jnp.float32)
    p["w3"] = cw(ks[4], 32, 16, 4);       p["b3"] = 0.1 * jax.random.normal(ks[5], (32,), jnp.float32)
    p["w4"] = cw(ks[6], 1, 32, 1);        p["b4"] = 0.1 * jax.random.normal(ks[7], (1,), jnp.float32)
    # BatchNorm affine params: PyTorch default init (weight=1, bias=0)
    p["g2"], p["be2"] = jnp.ones((16,), jnp.float32), jnp.zeros((16,), jnp.float32)
    p["g3"], p["be3"] = jnp.ones((32,), jnp.float32), jnp.zeros((32,), jnp.float32)
    return p


if __name__ == "__main__":
    image_nc = 1
    key = jax.random.PRNGKey(0)
    kx, kp = jax.random.split(key)
    # MNIST-like input (NCHW, like PyTorch). Batch 16 keeps the demo small but
    # makes the 25*N = 400-row LHS sublane-aligned and >= one MXU pass.
    x = jax.random.normal(kx, (16, image_nc, 28, 28), jnp.float32)
    params = init_params(kp, image_nc)
    ops = prepare_operands(params, image_nc)

    fwd = jax.jit(discriminator_forward)
    out = jax.block_until_ready(fwd(x, ops))
    ref = jax.block_until_ready(ref_forward(x, params))

    assert out.shape == (16,), f"unexpected output shape {out.shape}"
    # bf16 MXU operands + approx reciprocal in the sigmoid -> bf16-level tolerance.
    assert jnp.allclose(out, ref, rtol=2e-2, atol=2e-2), (out, ref)
    print("KERNEL_OK")
</pallas_src>

<mosaic_0001>
module attributes {stable_mosaic.version = 11 : i64} {
  func.func @_discriminator_kernel(%arg0: memref<400x256xbf16, #tpu.memory_space<vmem>>, %arg1: memref<256x128xbf16, #tpu.memory_space<vmem>>, %arg2: memref<128x16xbf16, #tpu.memory_space<vmem>>, %arg3: memref<256x32xbf16, #tpu.memory_space<vmem>>, %arg4: memref<8x128xf32, #tpu.memory_space<vmem>>, %arg5: memref<16x1xf32, #tpu.memory_space<vmem>>, %arg6: memref<16x256xf32, #tpu.memory_space<vmem>>) attributes {dimension_semantics = [], scalar_prefetch = 0 : i64, scratch_operands = 1 : i64, tpu.core_type = #tpu.core_type<tc>} {
    %c0 = arith.constant 0 : index
    %c0_0 = arith.constant 0 : index
    %0 = vector.load %arg4[%c0, %c0_0] : memref<8x128xf32, #tpu.memory_space<vmem>>, vector<8x128xf32>
    %c0_1 = arith.constant 0 : index
    %c0_2 = arith.constant 0 : index
    %1 = vector.load %arg0[%c0_1, %c0_2] : memref<400x256xbf16, #tpu.memory_space<vmem>>, vector<400x256xbf16>
    %c0_3 = arith.constant 0 : index
    %c0_4 = arith.constant 0 : index
    %2 = vector.load %arg1[%c0_3, %c0_4] : memref<256x128xbf16, #tpu.memory_space<vmem>>, vector<256x128xbf16>
    %cst = arith.constant dense<0.000000e+00> : vector<400x128xf32>
    %3 = tpu.matmul %1, %2, %cst {dimension_numbers = #tpu.dot_dimension_numbers<[1], [0], [0], [1], [0, 0, 1, 1], [], []>} : vector<400x256xbf16>, vector<256x128xbf16>, vector<400x128xf32> -> vector<400x128xf32>
    %4 = vector.extract_strided_slice %0 {offsets = [0, 0], sizes = [1, 128], strides = [1, 1]} : vector<8x128xf32> to vector<1x128xf32>
    %5 = vector.broadcast %4 : vector<1x128xf32> to vector<400x128xf32>
    %6 = arith.addf %3, %5 : vector<400x128xf32>
    %cst_5 = arith.constant 0.000000e+00 : f32
    %7 = vector.broadcast %cst_5 : f32 to vector<400x128xf32>
    %8 = arith.cmpf ogt, %6, %7 : vector<400x128xf32>
    %cst_6 = arith.constant 2.000000e-01 : f32
    %9 = vector.broadcast %cst_6 : f32 to vector<400x128xf32>
    %10 = arith.mulf %9, %6 : vector<400x128xf32>
    %11 = arith.select %8, %6, %10 : vector<400x128xi1>, vector<400x128xf32>
    %12 = arith.truncf %11 : vector<400x128xf32> to vector<400x128xbf16>
    %c0_7 = arith.constant 0 : index
    %c0_8 = arith.constant 0 : index
    %13 = vector.load %arg2[%c0_7, %c0_8] : memref<128x16xbf16, #tpu.memory_space<vmem>>, vector<128x16xbf16>
    %cst_9 = arith.constant dense<0.000000e+00> : vector<400x16xf32>
    %14 = tpu.matmul %12, %13, %cst_9 {dimension_numbers = #tpu.dot_dimension_numbers<[1], [0], [0], [1], [0, 0, 1, 1], [], []>} : vector<400x128xbf16>, vector<128x16xbf16>, vector<400x16xf32> -> vector<400x16xf32>
    %15 = vector.extract_strided_slice %0 {offsets = [1, 0], sizes = [1, 16], strides = [1, 1]} : vector<8x128xf32> to vector<1x16xf32>
    %16 = vector.broadcast %15 : vector<1x16xf32> to vector<400x16xf32>
    %17 = arith.addf %14, %16 : vector<400x16xf32>
    %cst_10 = arith.constant dense<0.000000e+00> : vector<16xf32>
    %18 = vector.multi_reduction <add>, %17, %cst_10 [0] : vector<400x16xf32> to vector<16xf32>
    %19 = vector.shape_cast %18 : vector<16xf32> to vector<1x16xf32>
    %cst_11 = arith.constant 2.500000e-03 : f32
    %20 = vector.broadcast %cst_11 : f32 to vector<1x16xf32>
    %21 = arith.mulf %19, %20 : vector<1x16xf32>
    %22 = arith.mulf %17, %17 : vector<400x16xf32>
    %cst_12 = arith.constant dense<0.000000e+00> : vector<16xf32>
    %23 = vector.multi_reduction <add>, %22, %cst_12 [0] : vector<400x16xf32> to vector<16xf32>
    %24 = vector.shape_cast %23 : vector<16xf32> to vector<1x16xf32>
    %cst_13 = arith.constant 2.500000e-03 : f32
    %25 = vector.broadcast %cst_13 : f32 to vector<1x16xf32>
    %26 = arith.mulf %24, %25 : vector<1x16xf32>
    %27 = arith.mulf %21, %21 : vector<1x16xf32>
    %28 = arith.subf %26, %27 : vector<1x16xf32>
    %cst_14 = arith.constant 0.000000e+00 : f32
    %29 = vector.broadcast %cst_14 : f32 to vector<1x16xf32>
    %30 = arith.maximumf %28, %29 : vector<1x16xf32>
    %31 = vector.extract_strided_slice %0 {offsets = [2, 0], sizes = [1, 16], strides = [1, 1]} : vector<8x128xf32> to vector<1x16xf32>
    %cst_15 = arith.constant 9.99999974E-6 : f32
    %32 = vector.broadcast %cst_15 : f32 to vector<1x16xf32>
    %33 = arith.addf %30, %32 : vector<1x16xf32>
    %34 = math.rsqrt %33 : vector<1x16xf32>
    %35 = arith.mulf %31, %34 : vector<1x16xf32>
    %36 = vector.extract_strided_slice %0 {offsets = [3, 0], sizes = [1, 16], strides = [1, 1]} : vector<8x128xf32> to vector<1x16xf32>
    %37 = arith.mulf %21, %35 : vector<1x16xf32>
    %38 = arith.subf %36, %37 : vector<1x16xf32>
    %39 = vector.broadcast %35 : vector<1x16xf32> to vector<400x16xf32>
    %40 = arith.mulf %17, %39 : vector<400x16xf32>
    %41 = vector.broadcast %38 : vector<1x16xf32> to vector<400x16xf32>
    %42 = arith.addf %40, %41 : vector<400x16xf32>
    %cst_16 = arith.constant 0.000000e+00 : f32
    %43 = vector.broadcast %cst_16 : f32 to vector<400x16xf32>
    %44 = arith.cmpf ogt, %42, %43 : vector<400x16xf32>
    %cst_17 = arith.constant 2.000000e-01 : f32
    %45 = vector.broadcast %cst_17 : f32 to vector<400x16xf32>
    %46 = arith.mulf %45, %42 : vector<400x16xf32>
    %47 = arith.select %44, %42, %46 : vector<400x16xi1>, vector<400x16xf32>
    %48 = vector.extract_strided_slice %47 {offsets = [0, 0], sizes = [16, 16], strides = [1, 1]} : vector<400x16xf32> to vector<16x16xf32>
    %c0_18 = arith.constant 0 : index
    %c0_19 = arith.constant 0 : index
    %49 = vector.load %arg6[%c0_18, %c0_19] : memref<16x256xf32, #tpu.memory_space<vmem>>, vector<16x16xf32>
    tpu.vector_store %arg6[%c0_18, %c0_19], %48 {strides = array<i32>} : memref<16x256xf32, #tpu.memory_space<vmem>>, vector<16x16xf32>,
    %50 = vector.extract_strided_slice %47 {offsets = [16, 0], sizes = [16, 16], strides = [1, 1]} : vector<400x16xf32> to vector<16x16xf32>
    %c0_20 = arith.constant 0 : index
    %c16 = arith.constant 16 : index
    %51 = vector.load %arg6[%c0_20, %c16] : memref<16x256xf32, #tpu.memory_space<vmem>>, vector<16x16xf32>
    tpu.vector_store %arg6[%c0_20, %c16], %50 {strides = array<i32>} : memref<16x256xf32, #tpu.memory_space<vmem>>, vector<16x16xf32>,
    %52 = vector.extract_strided_slice %47 {offsets = [32, 0], sizes = [16, 16], strides = [1, 1]} : vector<400x16xf32> to vector<16x16xf32>
    %c0_21 = arith.constant 0 : index
    %c32 = arith.constant 32 : index
    %53 = vector.load %arg6[%c0_21, %c32] : memref<16x256xf32, #tpu.memory_space<vmem>>, vector<16x16xf32>
    tpu.vector_store %arg6[%c0_21, %c32], %52 {strides = array<i32>} : memref<16x256xf32, #tpu.memory_space<vmem>>, vector<16x16xf32>,
    %54 = vector.extract_strided_slice %47 {offsets = [48, 0], sizes = [16, 16], strides = [1, 1]} : vector<400x16xf32> to vector<16x16xf32>
    %c0_22 = arith.constant 0 : index
    %c48 = arith.constant 48 : index
    %55 = vector.load %arg6[%c0_22, %c48] : memref<16x256xf32, #tpu.memory_space<vmem>>, vector<16x16xf32>
    tpu.vector_store %arg6[%c0_22, %c48], %54 {strides = array<i32>} : memref<16x256xf32, #tpu.memory_space<vmem>>, vector<16x16xf32>,
    %56 = vector.extract_strided_slice %47 {offsets = [80, 0], sizes = [16, 16], strides = [1, 1]} : vector<400x16xf32> to vector<16x16xf32>
    %c0_23 = arith.constant 0 : index
    %c64 = arith.constant 64 : index
    %57 = vector.load %arg6[%c0_23, %c64] : memref<16x256xf32, #tpu.memory_space<vmem>>, vector<16x16xf32>
    tpu.vector_store %arg6[%c0_23, %c64], %56 {strides = array<i32>} : memref<16x256xf32, #tpu.memory_space<vmem>>, vector<16x16xf32>,
    %58 = vector.extract_strided_slice %47 {offsets = [96, 0], sizes = [16, 16], strides = [1, 1]} : vector<400x16xf32> to vector<16x16xf32>
    %c0_24 = arith.constant 0 : index
    %c80 = arith.constant 80 : index
    %59 = vector.load %arg6[%c0_24, %c80] : memref<16x256xf32, #tpu.memory_space<vmem>>, vector<16x16xf32>
    tpu.vector_store %arg6[%c0_24, %c80], %58 {strides = array<i32>} : memref<16x256xf32, #tpu.memory_space<vmem>>, vector<16x16xf32>,
    %60 = vector.extract_strided_slice %47 {offsets = [112, 0], sizes = [16, 16], strides = [1, 1]} : vector<400x16xf32> to vector<16x16xf32>
    %c0_25 = arith.constant 0 : index
    %c96 = arith.constant 96 : index
    %61 = vector.load %arg6[%c0_25, %c96] : memref<16x256xf32, #tpu.memory_space<vmem>>, vector<16x16xf32>
    tpu.vector_store %arg6[%c0_25, %c96], %60 {strides = array<i32>} : memref<16x256xf32, #tpu.memory_space<vmem>>, vector<16x16xf32>,
    %62 = vector.extract_strided_slice %47 {offsets = [128, 0], sizes = [16, 16], strides = [1, 1]} : vector<400x16xf32> to vector<16x16xf32>
    %c0_26 = arith.constant 0 : index
    %c112 = arith.constant 112 : index
    %63 = vector.load %arg6[%c0_26, %c112] : memref<16x256xf32, #tpu.memory_space<vmem>>, vector<16x16xf32>
    tpu.vector_store %arg6[%c0_26, %c112], %62 {strides = array<i32>} : memref<16x256xf32, #tpu.memory_space<vmem>>, vector<16x16xf32>,
    %64 = vector.extract_strided_slice %47 {offsets = [160, 0], sizes = [16, 16], strides = [1, 1]} : vector<400x16xf32> to vector<16x16xf32>
    %c0_27 = arith.constant 0 : index
    %c128 = arith.constant 128 : index
    %65 = vector.load %arg6[%c0_27, %c128] : memref<16x256xf32, #tpu.memory_space<vmem>>, vector<16x16xf32>
    tpu.vector_store %arg6[%c0_27, %c128], %64 {strides = array<i32>} : memref<16x256xf32, #tpu.memory_space<vmem>>, vector<16x16xf32>,
    %66 = vector.extract_strided_slice %47 {offsets = [176, 0], sizes = [16, 16], strides = [1, 1]} : vector<400x16xf32> to vector<16x16xf32>
    %c0_28 = arith.constant 0 : index
    %c144 = arith.constant 144 : index
    %67 = vector.load %arg6[%c0_28, %c144] : memref<16x256xf32, #tpu.memory_space<vmem>>, vector<16x16xf32>
    tpu.vector_store %arg6[%c0_28, %c144], %66 {strides = array<i32>} : memref<16x256xf32, #tpu.memory_space<vmem>>, vector<16x16xf32>,
    %68 = vector.extract_strided_slice %47 {offsets = [192, 0], sizes = [16, 16], strides = [1, 1]} : vector<400x16xf32> to vector<16x16xf32>
    %c0_29 = arith.constant 0 : index
    %c160 = arith.constant 160 : index
    %69 = vector.load %arg6[%c0_29, %c160] : memref<16x256xf32, #tpu.memory_space<vmem>>, vector<16x16xf32>
    tpu.vector_store %arg6[%c0_29, %c160], %68 {strides = array<i32>} : memref<16x256xf32, #tpu.memory_space<vmem>>, vector<16x16xf32>,
    %70 = vector.extract_strided_slice %47 {offsets = [208, 0], sizes = [16, 16], strides = [1, 1]} : vector<400x16xf32> to vector<16x16xf32>
    %c0_30 = arith.constant 0 : index
    %c176 = arith.constant 176 : index
    %71 = vector.load %arg6[%c0_30, %c176] : memref<16x256xf32, #tpu.memory_space<vmem>>, vector<16x16xf32>
    tpu.vector_store %arg6[%c0_30, %c176], %70 {strides = array<i32>} : memref<16x256xf32, #tpu.memory_space<vmem>>, vector<16x16xf32>,
    %72 = vector.extract_strided_slice %47 {offsets = [240, 0], sizes = [16, 16], strides = [1, 1]} : vector<400x16xf32> to vector<16x16xf32>
    %c0_31 = arith.constant 0 : index
    %c192 = arith.constant 192 : index
    %73 = vector.load %arg6[%c0_31, %c192] : memref<16x256xf32, #tpu.memory_space<vmem>>, vector<16x16xf32>
    tpu.vector_store %arg6[%c0_31, %c192], %72 {strides = array<i32>} : memref<16x256xf32, #tpu.memory_space<vmem>>, vector<16x16xf32>,
    %74 = vector.extract_strided_slice %47 {offsets = [256, 0], sizes = [16, 16], strides = [1, 1]} : vector<400x16xf32> to vector<16x16xf32>
    %c0_32 = arith.constant 0 : index
    %c208 = arith.constant 208 : index
    %75 = vector.load %arg6[%c0_32, %c208] : memref<16x256xf32, #tpu.memory_space<vmem>>, vector<16x16xf32>
    tpu.vector_store %arg6[%c0_32, %c208], %74 {strides = array<i32>} : memref<16x256xf32, #tpu.memory_space<vmem>>, vector<16x16xf32>,
    %76 = vector.extract_strided_slice %47 {offsets = [272, 0], sizes = [16, 16], strides = [1, 1]} : vector<400x16xf32> to vector<16x16xf32>
    %c0_33 = arith.constant 0 : index
    %c224 = arith.constant 224 : index
    %77 = vector.load %arg6[%c0_33, %c224] : memref<16x256xf32, #tpu.memory_space<vmem>>, vector<16x16xf32>
    tpu.vector_store %arg6[%c0_33, %c224], %76 {strides = array<i32>} : memref<16x256xf32, #tpu.memory_space<vmem>>, vector<16x16xf32>,
    %78 = vector.extract_strided_slice %47 {offsets = [288, 0], sizes = [16, 16], strides = [1, 1]} : vector<400x16xf32> to vector<16x16xf32>
    %c0_34 = arith.constant 0 : index
    %c240 = arith.constant 240 : index
    %79 = vector.load %arg6[%c0_34, %c240] : memref<16x256xf32, #tpu.memory_space<vmem>>, vector<16x16xf32>
    tpu.vector_store %arg6[%c0_34, %c240], %78 {strides = array<i32>} : memref<16x256xf32, #tpu.memory_space<vmem>>, vector<16x16xf32>,
    %c0_35 = arith.constant 0 : index
    %c0_36 = arith.constant 0 : index
    %80 = vector.load %arg6[%c0_35, %c0_36] : memref<16x256xf32, #tpu.memory_space<vmem>>, vector<16x256xf32>
    %81 = arith.truncf %80 : vector<16x256xf32> to vector<16x256xbf16>
    %c0_37 = arith.constant 0 : index
    %c0_38 = arith.constant 0 : index
    %82 = vector.load %arg3[%c0_37, %c0_38] : memref<256x32xbf16, #tpu.memory_space<vmem>>, vector<256x32xbf16>
    %cst_39 = arith.constant dense<0.000000e+00> : vector<16x32xf32>
    %83 = tpu.matmul %81, %82, %cst_39 {dimension_numbers = #tpu.dot_dimension_numbers<[1], [0], [0], [1], [0, 0, 1, 1], [], []>} : vector<16x256xbf16>, vector<256x32xbf16>, vector<16x32xf32> -> vector<16x32xf32>
    %84 = vector.extract_strided_slice %0 {offsets = [4, 0], sizes = [1, 32], strides = [1, 1]} : vector<8x128xf32> to vector<1x32xf32>
    %85 = vector.broadcast %84 : vector<1x32xf32> to vector<16x32xf32>
    %86 = arith.addf %83, %85 : vector<16x32xf32>
    %cst_40 = arith.constant dense<0.000000e+00> : vector<32xf32>
    %87 = vector.multi_reduction <add>, %86, %cst_40 [0] : vector<16x32xf32> to vector<32xf32>
    %88 = vector.shape_cast %87 : vector<32xf32> to vector<1x32xf32>
    %cst_41 = arith.constant 6.250000e-02 : f32
    %89 = vector.broadcast %cst_41 : f32 to vector<1x32xf32>
    %90 = arith.mulf %88, %89 : vector<1x32xf32>
    %91 = arith.mulf %86, %86 : vector<16x32xf32>
    %cst_42 = arith.constant dense<0.000000e+00> : vector<32xf32>
    %92 = vector.multi_reduction <add>, %91, %cst_42 [0] : vector<16x32xf32> to vector<32xf32>
    %93 = vector.shape_cast %92 : vector<32xf32> to vector<1x32xf32>
    %cst_43 = arith.constant 6.250000e-02 : f32
    %94 = vector.broadcast %cst_43 : f32 to vector<1x32xf32>
    %95 = arith.mulf %93, %94 : vector<1x32xf32>
    %96 = arith.mulf %90, %90 : vector<1x32xf32>
    %97 = arith.subf %95, %96 : vector<1x32xf32>
    %cst_44 = arith.constant 0.000000e+00 : f32
    %98 = vector.broadcast %cst_44 : f32 to vector<1x32xf32>
    %99 = arith.maximumf %97, %98 : vector<1x32xf32>
    %100 = vector.extract_strided_slice %0 {offsets = [5, 0], sizes = [1, 32], strides = [1, 1]} : vector<8x128xf32> to vector<1x32xf32>
    %cst_45 = arith.constant 9.99999974E-6 : f32
    %101 = vector.broadcast %cst_45 : f32 to vector<1x32xf32>
    %102 = arith.addf %99, %101 : vector<1x32xf32>
    %103 = math.rsqrt %102 : vector<1x32xf32>
    %104 = arith.mulf %100, %103 : vector<1x32xf32>
    %105 = vector.extract_strided_slice %0 {offsets = [6, 0], sizes = [1, 32], strides = [1, 1]} : vector<8x128xf32> to vector<1x32xf32>
    %106 = arith.mulf %90, %104 : vector<1x32xf32>
    %107 = arith.subf %105, %106 : vector<1x32xf32>
    %108 = vector.broadcast %104 : vector<1x32xf32> to vector<16x32xf32>
    %109 = arith.mulf %86, %108 : vector<16x32xf32>
    %110 = vector.broadcast %107 : vector<1x32xf32> to vector<16x32xf32>
    %111 = arith.addf %109, %110 : vector<16x32xf32>
    %cst_46 = arith.constant 0.000000e+00 : f32
    %112 = vector.broadcast %cst_46 : f32 to vector<16x32xf32>
    %113 = arith.cmpf ogt, %111, %112 : vector<16x32xf32>
    %cst_47 = arith.constant 2.000000e-01 : f32
    %114 = vector.broadcast %cst_47 : f32 to vector<16x32xf32>
    %115 = arith.mulf %114, %111 : vector<16x32xf32>
    %116 = arith.select %113, %111, %115 : vector<16x32xi1>, vector<16x32xf32>
    %117 = vector.extract_strided_slice %0 {offsets = [7, 0], sizes = [1, 32], strides = [1, 1]} : vector<8x128xf32> to vector<1x32xf32>
    %118 = vector.broadcast %117 : vector<1x32xf32> to vector<16x32xf32>
    %119 = arith.mulf %116, %118 : vector<16x32xf32>
    %cst_48 = arith.constant dense<0.000000e+00> : vector<16xf32>
    %120 = vector.multi_reduction <add>, %119, %cst_48 [1] : vector<16x32xf32> to vector<16xf32>
    %121 = vector.shape_cast %120 : vector<16xf32> to vector<16x1xf32>
    %122 = vector.extract_strided_slice %0 {offsets = [7, 32], sizes = [1, 1], strides = [1, 1]} : vector<8x128xf32> to vector<1x1xf32>
    %123 = vector.broadcast %122 : vector<1x1xf32> to vector<16x1xf32>
    %124 = arith.addf %121, %123 : vector<16x1xf32>
    %cst_49 = arith.constant 0.000000e+00 : f32
    %125 = vector.broadcast %cst_49 : f32 to vector<16x1xf32>
    %126 = arith.subf %125, %124 : vector<16x1xf32>
    %127 = math.exp %126 : vector<16x1xf32>
    %cst_50 = arith.constant 1.000000e+00 : f32
    %128 = vector.broadcast %cst_50 : f32 to vector<16x1xf32>
    %129 = arith.addf %128, %127 : vector<16x1xf32>
    %130 = tpu.reciprocal %129 {approx = true} : vector<16x1xf32> -> vector<16x1xf32>
    %c0_51 = arith.constant 0 : index
    %c0_52 = arith.constant 0 : index
    %131 = vector.load %arg5[%c0_51, %c0_52] : memref<16x1xf32, #tpu.memory_space<vmem>>, vector<16x1xf32>
    tpu.vector_store %arg5[%c0_51, %c0_52], %130 {strides = array<i32>} : memref<16x1xf32, #tpu.memory_space<vmem>>, vector<16x1xf32>,
    return
  }
}

</mosaic_0001>

<bundles_post_ra>
// kernel: discriminator_forward.1
= control target key start
LH: loop header
LB: loop body
LE: loop exit
PB: predicated region body
PF: predicated region fallthrough
CT: control target
= control target key end

     0   :  { %v2425_v0 = vmov 0   ;;  %v2426_v34 = vmov 0.0   ;;  %vm2427_vm0 = vmmov 0   ;;  %s2428_s10 = smov 16   ;;  %s2429_s12 = smov 32   ;;  %s3418_s1 = inlined_call_operand.vmem [shape: bf16[256,128], index: 1, kind: input, shape index: {}]   ;;  %s3419_s0 = inlined_call_operand.vmem [shape: bf16[400,256], index: 0, kind: input, shape index: {}]   ;;  %s3420_s2 = inlined_call_operand.vmem [shape: bf16[128,16], index: 2, kind: input, shape index: {}]   ;;  %s3421_s4 = inlined_call_operand.vmem [shape: f32[8,128], index: 4, kind: input, shape index: {}]   ;;  %s3422_s3 = inlined_call_operand.vmem [shape: bf16[256,32], index: 3, kind: input, shape index: {}]   ;;  %s3423_s5 = inlined_call_operand.vmem [shape: f32[16,1], index: 5, kind: output, shape index: {}]  }
   0x1   :  { %454 = vmatprep.subr.bf16.mxu0 %v2425_v0  ;;  %v2297_v1 = vld [vmem:[%s3418_s1] sm:$0xff]   ;;  %v2298_v2 = vld [vmem:[%s3418_s1 + $0x8] sm:$0xff]   ;;  %v2299_v3 = vld [vmem:[%s3418_s1 + $0x10] sm:$0xff]   ;;  %2171 = vmatprep.subr.bf16.mxu1 %v2426_v34  ;;  %s2430_s13 = smov 48   ;;  %s2431_s14 = smov 64  }
   0x2   :  { %455 = vmatpush1.bf16.msra.mxu0 %v2297_v1  ;;  %v2300_v4 = vld [vmem:[%s3418_s1 + $0x18] sm:$0xff]   ;;  %v2301_v5 = vld [vmem:[%s3418_s1 + $0x20] sm:$0xff]   ;;  %v2302_v7 = vld [vmem:[%s3418_s1 + $0x28] sm:$0xff]   ;;  %2187 = vmatprep.mubr.msk.bf16.mxu1 %vm2427_vm0, %v2426_v34  ;;  %s2434_s19 = smov 112  }
   0x3   :  { %456 = vmatprep.subr.bf16.mxu0 %v2425_v0  ;;  %v2315_v6 = vld [vmem:[%s3419_s0 + $0x4] ss:$8 sps:$4 sm:$0xff]   ;;  %v2303_v8 = vld [vmem:[%s3418_s1 + $0x30] sm:$0xff]   ;;  %v2304_v9 = vld [vmem:[%s3418_s1 + $0x38] sm:$0xff]  }
   0x4   :  { %486 = vmatprep.mubr.bf16.mxu0 %v2315_v6  ;;  %v2305_v10 = vld [vmem:[%s3418_s1 + $0x40] sm:$0xff]   ;;  %v2306_v11 = vld [vmem:[%s3418_s1 + $0x48] sm:$0xff]   ;;  %v2307_v12 = vld [vmem:[%s3418_s1 + $0x50] sm:$0xff]  }
   0x5   :  { %v2308_v13 = vld [vmem:[%s3418_s1 + $0x58] sm:$0xff]   ;;  %v2309_v14 = vld [vmem:[%s3418_s1 + $0x60] sm:$0xff]   ;;  %v2310_v15 = vld [vmem:[%s3418_s1 + $0x68] sm:$0xff]  }
   0x6   :  { %457 = vmatpush1.bf16.msra.mxu0 %v2298_v2  ;;  %v2311_v16 = vld [vmem:[%s3418_s1 + $0x70] sm:$0xff]   ;;  %v2312_v17 = vld [vmem:[%s3418_s1 + $0x78] sm:$0xff]   ;;  %v2313_v18 = vld [vmem:[%s3419_s0] ss:$8 sps:$4 sm:$0xff]  }
   0x7   :  { %458 = vmatprep.subr.bf16.mxu0 %v2425_v0  ;;  %v2316_v19 = vld [vmem:[%s3419_s0 + $0x14] ss:$8 sps:$4 sm:$0xff]   ;;  %v2318_v20 = vld [vmem:[%s3419_s0 + $0x10] ss:$8 sps:$4 sm:$0xff]   ;;  %v2319_v21 = vld [vmem:[%s3419_s0 + $0x24] ss:$8 sps:$4 sm:$0xff]  }
   0x8   :  { %v2321_v22 = vld [vmem:[%s3419_s0 + $0x20] ss:$8 sps:$4 sm:$0xff]   ;;  %v2322_v23 = vld [vmem:[%s3419_s0 + $0x34] ss:$8 sps:$4 sm:$0xff]   ;;  %v2324_v24 = vld [vmem:[%s3419_s0 + $0x30] ss:$8 sps:$4 sm:$0xff]  }
   0x9   :  { %v2325_v25 = vld [vmem:[%s3419_s0 + $0x44] ss:$8 sps:$4 sm:$0xff]   ;;  %v2327_v26 = vld [vmem:[%s3419_s0 + $0x40] ss:$8 sps:$4 sm:$0xff]   ;;  %v2328_v27 = vld [vmem:[%s3419_s0 + $0x54] ss:$8 sps:$4 sm:$0xff]  }
   0xa   :  { %459 = vmatpush1.bf16.msra.mxu0 %v2299_v3  ;;  %v2330_v28 = vld [vmem:[%s3419_s0 + $0x50] ss:$8 sps:$4 sm:$0xff]   ;;  %v2331_v29 = vld [vmem:[%s3419_s0 + $0x64] ss:$8 sps:$4 sm:$0xff]   ;;  %v2333_v30 = vld [vmem:[%s3419_s0 + $0x60] ss:$8 sps:$4 sm:$0xff]  }
   0xb   :  { %460 = vmatprep.subr.bf16.mxu0 %v2425_v0  ;;  %v2334_v31 = vld [vmem:[%s3419_s0 + $0x74] ss:$8 sps:$4 sm:$0xff]   ;;  %v2336_v32 = vld [vmem:[%s3419_s0 + $0x70] ss:$8 sps:$4 sm:$0xff]   ;;  %v2337_v33 = vld [vmem:[%s3419_s0 + $0x84] ss:$8 sps:$4 sm:$0xff]  }
   0xc   :  { %v2385_v35 = vld [vmem:[%s3420_s2] sm:$0xff]   ;;  %v2340_v37 = vld [vmem:[%s3419_s0 + $0x94] ss:$8 sps:$4 sm:$0xff]   ;;  %v2389_v38 = vld [vmem:[%s3420_s2 + $0x8] sm:$0xff]  }
   0xd   :  { %v2339_v36 = vld [vmem:[%s3419_s0 + $0x80] ss:$8 sps:$4 sm:$0xff]   ;;  %2172 = vmatpush3.bf16.msra.mxu1 %v2385_v35  ;;  %v2390_v39 = vld [vmem:[%s3420_s2 + $0x10] sm:$0xff]   ;;  %v2343_v41 = vld [vmem:[%s3419_s0 + $0xa4] ss:$8 sps:$4 sm:$0xff]  }
   0xe   :  { %461 = vmatpush1.bf16.msra.mxu0 %v2300_v4  ;;  %2173 = vmatprep.subr.bf16.mxu1 %v2426_v34  ;;  %v2342_v40 = vld [vmem:[%s3419_s0 + $0x90] ss:$8 sps:$4 sm:$0xff]   ;;  %v2392_v43 = vld [vmem:[%s3420_s2 + $0x20] sm:$0xff]   ;;  %v2346_v45 = vld [vmem:[%s3419_s0 + $0xb4] ss:$8 sps:$4 sm:$0xff]  }
   0xf   :  { %462 = vmatprep.subr.bf16.mxu0 %v2425_v0  ;;  %v2391_v42 = vld [vmem:[%s3420_s2 + $0x18] sm:$0xff]   ;;  %v2345_v44 = vld [vmem:[%s3419_s0 + $0xa0] ss:$8 sps:$4 sm:$0xff]   ;;  %v2394_v48 = vld [vmem:[%s3420_s2 + $0x30] sm:$0xff]  }
  0x10   :  { %v2393_v46 = vld [vmem:[%s3420_s2 + $0x28] sm:$0xff]   ;;  %v2348_v47 = vld [vmem:[%s3419_s0 + $0xb0] ss:$8 sps:$4 sm:$0xff]   ;;  %v2352_v52 = vld [vmem:[%s3419_s0 + $0xd4] ss:$8 sps:$4 sm:$0xff]  }
  0x11   :  { %2174 = vmatpush3.bf16.msra.mxu1 %v2389_v38  ;;  %v2349_v49 = vld [vmem:[%s3419_s0 + $0xc4] ss:$8 sps:$4 sm:$0xff]   ;;  %v2395_v50 = vld [vmem:[%s3420_s2 + $0x38] sm:$0xff]   ;;  %v2351_v51 = vld [vmem:[%s3419_s0 + $0xc0] ss:$8 sps:$4 sm:$0xff]   ;;  %s2433_s2 = smov 96  }
  0x12   :  { %463 = vmatpush1.bf16.msra.mxu0 %v2301_v5  ;;  %2175 = vmatprep.subr.bf16.mxu1 %v2426_v34  ;;  %v2354_v53 = vld [vmem:[%s3419_s0 + $0xd0] ss:$8 sps:$4 sm:$0xff]   ;;  %v2355_v54 = vld [vmem:[%s3419_s0 + $0xe4] ss:$8 sps:$4 sm:$0xff]   ;;  %v2357_v55 = vld [vmem:[%s3419_s0 + $0xe0] ss:$8 sps:$4 sm:$0xff]  }
  0x13   :  { %464 = vmatprep.subr.bf16.mxu0 %v2425_v0  ;;  %v2358_v56 = vld [vmem:[%s3419_s0 + $0xf4] ss:$8 sps:$4 sm:$0xff]   ;;  %v2360_v57 = vld [vmem:[%s3419_s0 + $0xf0] ss:$8 sps:$4 sm:$0xff]   ;;  %v2361_v58 = vld [vmem:[%s3419_s0 + $0x104] ss:$8 sps:$4 sm:$0xff]  }
  0x14   :  { %v2363_v59 = vld [vmem:[%s3419_s0 + $0x100] ss:$8 sps:$4 sm:$0xff]   ;;  %v2364_v60 = vld [vmem:[%s3419_s0 + $0x114] ss:$8 sps:$4 sm:$0xff]   ;;  %v2366_v61 = vld [vmem:[%s3419_s0 + $0x110] ss:$8 sps:$4 sm:$0xff]  }
  0x15   :  { %2176 = vmatpush3.bf16.msra.mxu1 %v2390_v39  ;;  %v2367_v62 = vld [vmem:[%s3419_s0 + $0x124] ss:$8 sps:$4 sm:$0xff]   ;;  %v2369_v63 = vld [vmem:[%s3419_s0 + $0x120] ss:$8 sps:$4 sm:$0xff]   ;;  %v2372_v1 = vld [vmem:[%s3419_s0 + $0x130] ss:$8 sps:$4 sm:$0xff]  }
  0x16   :  { %465 = vmatpush1.bf16.msra.mxu0 %v2302_v7  ;;  %2177 = vmatprep.subr.bf16.mxu1 %v2426_v34  ;;  %v2373_v2 = vld [vmem:[%s3419_s0 + $0x144] ss:$8 sps:$4 sm:$0xff]   ;;  %v2375_v3 = vld [vmem:[%s3419_s0 + $0x140] ss:$8 sps:$4 sm:$0xff]   ;;  %v2376_v4 = vld [vmem:[%s3419_s0 + $0x154] ss:$8 sps:$4 sm:$0xff]  }
  0x17   :  { %466 = vmatprep.subr.bf16.mxu0 %v2425_v0  ;;  %v2378_v5 = vld [vmem:[%s3419_s0 + $0x150] ss:$8 sps:$4 sm:$0xff]   ;;  %v2379_v6 = vld [vmem:[%s3419_s0 + $0x164] ss:$8 sps:$4 sm:$0xff]   ;;  %v2381_v7 = vld [vmem:[%s3419_s0 + $0x160] ss:$8 sps:$4 sm:$0xff]  }
  0x19   :  { %2178 = vmatpush3.bf16.msra.mxu1 %v2391_v42 }
  0x1a   :  { %467 = vmatpush1.bf16.msra.mxu0 %v2303_v8  ;;  %2179 = vmatprep.subr.bf16.mxu1 %v2426_v34  ;;  %v2382_v8 = vld [vmem:[%s3419_s0 + $0x174] ss:$8 sps:$4 sm:$0xff]  }
  0x1b   :  { %468 = vmatprep.subr.bf16.mxu0 %v2425_v0 }
  0x1d   :  { %2180 = vmatpush3.bf16.msra.mxu1 %v2392_v43 }
  0x1e   :  { %469 = vmatpush1.bf16.msra.mxu0 %v2304_v9  ;;  %2181 = vmatprep.subr.bf16.mxu1 %v2426_v34  ;;  %v2384_v9 = vld [vmem:[%s3419_s0 + $0x170] ss:$8 sps:$4 sm:$0xff]  }
  0x1f   :  { %470 = vmatprep.subr.bf16.mxu0 %v2425_v0 }
  0x21   :  { %2182 = vmatpush3.bf16.msra.mxu1 %v2393_v46 }
  0x22   :  { %471 = vmatpush1.bf16.msra.mxu0 %v2305_v10  ;;  %2183 = vmatprep.subr.bf16.mxu1 %v2426_v34  ;;  %v2386_v10 = vld [vmem:[%s3419_s0 + $0x184] ss:$8 sps:$4 sm:$0xff]  }
  0x23   :  { %472 = vmatprep.subr.bf16.mxu0 %v2425_v0 }
  0x25   :  { %2184 = vmatpush3.bf16.msra.mxu1 %v2394_v48 }
  0x26   :  { %473 = vmatpush1.bf16.msra.mxu0 %v2306_v11  ;;  %2185 = vmatprep.subr.bf16.mxu1 %v2426_v34  ;;  %v2388_v11 = vld [vmem:[%s3419_s0 + $0x180] ss:$8 sps:$4 sm:$0xff]  }
  0x27   :  { %474 = vmatprep.subr.bf16.mxu0 %v2425_v0 }
  0x29   :  { %2186 = vmatpush3.bf16.msra.mxu1 %v2395_v50 }
  0x2a   :  { %475 = vmatpush1.bf16.msra.mxu0 %v2307_v12  ;;  %v104_v12 = vlaneseq }
  0x2b   :  { %476 = vmatprep.subr.bf16.mxu0 %v2425_v0 }
  0x2e   :  { %477 = vmatpush1.bf16.msra.mxu0 %v2308_v13  ;;  %v2697_v13 = vshrl.u32 %v104_v12, 7 }
  0x2f   :  { %478 = vmatprep.subr.bf16.mxu0 %v2425_v0 }
  0x32   :  { %479 = vmatpush1.bf16.msra.mxu0 %v2309_v14  ;;  %v106_v14 = vsub.s32 0, %v2697_v13 }
  0x33   :  { %480 = vmatprep.subr.bf16.mxu0 %v2425_v0 }
  0x36   :  { %481 = vmatpush1.bf16.msra.mxu0 %v2310_v15  ;;  %v2703_v15 = vld [vmem:[%s3421_s4] sm:$0xff] }
  0x37   :  { %482 = vmatprep.subr.bf16.mxu0 %v2425_v0 }
  0x3a   :  { %483 = vmatpush1.bf16.msra.mxu0 %v2311_v16  ;;  %v2706_v16 = vrot.slane %v2703_v15, %v106_v14 }
  0x3b   :  { %484 = vmatprep.subr.bf16.mxu0 %v2425_v0  ;;  %v2370_v0 = vld [vmem:[%s3419_s0 + $0x134] ss:$8 sps:$4 sm:$0xff]  }
  0x3e   :  { %485 = vmatpush1.bf16.msra.mxu0 %v2312_v17 }
  0x41   :  { %487 = vmatmul.mubr.bf16.vlgmr.msra.gmra.mrb[0].mxu0 %v2313_v18 }
  0x42   :  { %494 = vmatprep.mubr.bf16.mxu0 %v2316_v19 }
  0x49   :  { %495 = vmatmul.mubr.bf16.gmra.mrb[4].mxu0 %v2318_v20 }
  0x4a   :  { %502 = vmatprep.mubr.bf16.mxu0 %v2319_v21 }
  0x51   :  { %503 = vmatmul.mubr.bf16.gmra.mrb[8].mxu0 %v2321_v22 }
  0x52   :  { %510 = vmatprep.mubr.bf16.mxu0 %v2322_v23 }
  0x59   :  { %511 = vmatmul.mubr.bf16.gmra.mrb[12].mxu0 %v2324_v24 }
  0x5a   :  { %518 = vmatprep.mubr.bf16.mxu0 %v2325_v25 }
  0x61   :  { %519 = vmatmul.mubr.bf16.gmra.mrb[16].mxu0 %v2327_v26 }
  0x62   :  { %526 = vmatprep.mubr.bf16.mxu0 %v2328_v27 }
  0x69   :  { %527 = vmatmul.mubr.bf16.gmra.mrb[20].mxu0 %v2330_v28 }
  0x6a   :  { %534 = vmatprep.mubr.bf16.mxu0 %v2331_v29 }
  0x71   :  { %535 = vmatmul.mubr.bf16.gmra.mrb[24].mxu0 %v2333_v30 }
  0x72   :  { %542 = vmatprep.mubr.bf16.mxu0 %v2334_v31 }
  0x79   :  { %543 = vmatmul.mubr.bf16.gmra.mrb[28].mxu0 %v2336_v32 }
  0x7a   :  { %550 = vmatprep.mubr.bf16.mxu0 %v2337_v33 }
  0x81   :  { %551 = vmatmul.mubr.bf16.gmra.mrb[32].mxu0 %v2339_v36 }
  0x82   :  { %558 = vmatprep.mubr.bf16.mxu0 %v2340_v37 }
  0x89   :  { %559 = vmatmul.mubr.bf16.gmra.mrb[36].mxu0 %v2342_v40 }
  0x8a   :  { %566 = vmatprep.mubr.bf16.mxu0 %v2343_v41 }
  0x91   :  { %567 = vmatmul.mubr.bf16.gmra.mrb[40].mxu0 %v2345_v44 }
  0x92   :  { %574 = vmatprep.mubr.bf16.mxu0 %v2346_v45 }
  0x99   :  { %575 = vmatmul.mubr.bf16.gmra.mrb[44].mxu0 %v2348_v47 }
  0x9a   :  { %582 = vmatprep.mubr.bf16.mxu0 %v2349_v49 }
  0xa1   :  { %583 = vmatmul.mubr.bf16.gmra.mrb[48].mxu0 %v2351_v51 }
  0xa2   :  { %590 = vmatprep.mubr.bf16.mxu0 %v2352_v52 }
  0xa9   :  { %591 = vmatmul.mubr.bf16.gmra.mrb[52].mxu0 %v2354_v53 }
  0xaa   :  { %598 = vmatprep.mubr.bf16.mxu0 %v2355_v54 }
  0xb1   :  { %599 = vmatmul.mubr.bf16.gmra.mrb[56].mxu0 %v2357_v55 }
  0xb2   :  { %606 = vmatprep.mubr.bf16.mxu0 %v2358_v56 }
  0xb9   :  { %607 = vmatmul.mubr.bf16.gmra.mrb[60].mxu0 %v2360_v57 }
  0xba   :  { %614 = vmatprep.mubr.bf16.mxu0 %v2361_v58 }
  0xc1   :  { %615 = vmatmul.mubr.bf16.gmra.mrb[64].mxu0 %v2363_v59 }
  0xc2   :  { %622 = vmatprep.mubr.bf16.mxu0 %v2364_v60 }
  0xc9   :  { %623 = vmatmul.mubr.bf16.gmra.mrb[68].mxu0 %v2366_v61 }
  0xca   :  { %630 = vmatprep.mubr.bf16.mxu0 %v2367_v62 }
  0xd1   :  { %631 = vmatmul.mubr.bf16.gmra.mrb[72].mxu0 %v2369_v63 }
  0xd2   :  { %638 = vmatprep.mubr.bf16.mxu0 %v2370_v0 }
  0xd9   :  { %639 = vmatmul.mubr.bf16.gmra.mrb[76].mxu0 %v2372_v1 }
  0xda   :  { %646 = vmatprep.mubr.bf16.mxu0 %v2373_v2 }
  0xe1   :  { %647 = vmatmul.mubr.bf16.gmra.mrb[80].mxu0 %v2375_v3 }
  0xe2   :  { %654 = vmatprep.mubr.bf16.mxu0 %v2376_v4 }
  0xe9   :  { %655 = vmatmul.mubr.bf16.gmra.mrb[84].mxu0 %v2378_v5 }
  0xea   :  { %662 = vmatprep.mubr.bf16.mxu0 %v2379_v6 }
  0xf1   :  { %663 = vmatmul.mubr.bf16.gmra.mrb[88].mxu0 %v2381_v7 }
  0xf2   :  { %670 = vmatprep.mubr.bf16.mxu0 %v2382_v8 }
  0xf9   :  { %671 = vmatmul.mubr.bf16.gmra.mrb[92].mxu0 %v2384_v9 }
  0xfa   :  { %678 = vmatprep.mubr.bf16.mxu0 %v2386_v10 }
 0x101   :  { %679 = vmatmul.mubr.bf16.gmra.mrb[96].mxu0 %v2388_v11 }
 0x114   :  { %v488_v17 = vpop.f32.mrb[0].mxu0 }
 0x115   :  { %v489_v18 = vadd.f32 %v488_v17, %v2706_v16  ;;  %v490_v19 = vpop.f32.mrb[1].mxu0 }
 0x116   :  { %v491_v20 = vpop.f32.mrb[2].mxu0 }
 0x117   :  { %v737_v21 = vmul.f32 0.2, %v489_v18  ;;  %v492_v22 = vadd.f32 %v491_v20, %v2706_v16  ;;  %v493_v23 = vpop.f32.mrb[3].mxu0  ;;  %vm687_vm1 = vcmp.gt.f32.partialorder %v489_v18, 0.0 }
 0x119   :  { %vm688_vm2 = vcmp.gt.f32.partialorder %v492_v22, 0.0  ;;  %v738_v24 = vmul.f32 0.2, %v492_v22  ;;  %v787_v25 = vsel %vm687_vm1, %v489_v18, %v737_v21 }
 0x11b   :  { %v788_v26 = vsel %vm688_vm2, %v492_v22, %v738_v24 }
 0x11c   :  { %v496_v27 = vpop.f32.mrb[4].mxu0  ;;  %v837_v28 = vpack.c.bf16 %v788_v26, %v787_v25 }
 0x11d   :  { %v497_v29 = vadd.f32 %v496_v27, %v2706_v16  ;;  %v498_v30 = vpop.f32.mrb[5].mxu0 }
 0x11e   :  { %v499_v31 = vpop.f32.mrb[6].mxu0  ;;  %2188 = vmatmul.mubr.bf16.vlgmr.msra.gmra.mrb[0].mxu1 %v837_v28 }
 0x11f   :  { %v739_v32 = vmul.f32 0.2, %v497_v29  ;;  %v500_v33 = vadd.f32 %v499_v31, %v2706_v16  ;;  %v501_v35 = vpop.f32.mrb[7].mxu0  ;;  %2191 = vmatprep.mubr.msk.bf16.mxu1 %vm2427_vm0, %v2426_v34  ;;  %vm689_vm3 = vcmp.gt.f32.partialorder %v497_v29, 0.0 }
 0x121   :  { %vm690_vm4 = vcmp.gt.f32.partialorder %v500_v33, 0.0  ;;  %v740_v36 = vmul.f32 0.2, %v500_v33  ;;  %v789_v37 = vsel %vm689_vm3, %v497_v29, %v739_v32 }
 0x123   :  { %v790_v38 = vsel %vm690_vm4, %v500_v33, %v740_v36 }
 0x124   :  { %v504_v39 = vpop.f32.mrb[8].mxu0  ;;  %v838_v40 = vpack.c.bf16 %v790_v38, %v789_v37 }
 0x125   :  { %v505_v41 = vadd.f32 %v504_v39, %v2706_v16  ;;  %v506_v42 = vpop.f32.mrb[9].mxu0 }
 0x126   :  { %v507_v43 = vpop.f32.mrb[10].mxu0  ;;  %2192 = vmatmul.mubr.bf16.gmra.mrb[4].mxu1 %v838_v40 }
 0x127   :  { %v741_v44 = vmul.f32 0.2, %v505_v41  ;;  %v508_v45 = vadd.f32 %v507_v43, %v2706_v16  ;;  %v509_v46 = vpop.f32.mrb[11].mxu0  ;;  %2195 = vmatprep.mubr.msk.bf16.mxu1 %vm2427_vm0, %v2426_v34  ;;  %vm691_vm5 = vcmp.gt.f32.partialorder %v505_v41, 0.0 }
 0x129   :  { %vm692_vm6 = vcmp.gt.f32.partialorder %v508_v45, 0.0  ;;  %v742_v47 = vmul.f32 0.2, %v508_v45  ;;  %v791_v48 = vsel %vm691_vm5, %v505_v41, %v741_v44 }
 0x12b   :  { %v792_v49 = vsel %vm692_vm6, %v508_v45, %v742_v47 }
 0x12c   :  { %v512_v50 = vpop.f32.mrb[12].mxu0  ;;  %v839_v51 = vpack.c.bf16 %v792_v49, %v791_v48 }
 0x12d   :  { %v513_v52 = vadd.f32 %v512_v50, %v2706_v16  ;;  %v514_v53 = vpop.f32.mrb[13].mxu0 }
 0x12e   :  { %v515_v54 = vpop.f32.mrb[14].mxu0  ;;  %2196 = vmatmul.mubr.bf16.gmra.mrb[8].mxu1 %v839_v51 }
 0x12f   :  { %v743_v55 = vmul.f32 0.2, %v513_v52  ;;  %v516_v56 = vadd.f32 %v515_v54, %v2706_v16  ;;  %v517_v57 = vpop.f32.mrb[15].mxu0  ;;  %2199 = vmatprep.mubr.msk.bf16.mxu1 %vm2427_vm0, %v2426_v34  ;;  %vm693_vm7 = vcmp.gt.f32.partialorder %v513_v52, 0.0 }
 0x131   :  { %vm694_vm8 = vcmp.gt.f32.partialorder %v516_v56, 0.0  ;;  %v744_v58 = vmul.f32 0.2, %v516_v56  ;;  %v793_v59 = vsel %vm693_vm7, %v513_v52, %v743_v55 }
 0x133   :  { %v794_v60 = vsel %vm694_vm8, %v516_v56, %v744_v58 }
 0x134   :  { %v520_v61 = vpop.f32.mrb[16].mxu0  ;;  %v840_v62 = vpack.c.bf16 %v794_v60, %v793_v59 }
 0x135   :  { %v521_v63 = vadd.f32 %v520_v61, %v2706_v16  ;;  %v522_v0 = vpop.f32.mrb[17].mxu0 }
 0x136   :  { %v523_v1 = vpop.f32.mrb[18].mxu0  ;;  %2200 = vmatmul.mubr.bf16.gmra.mrb[12].mxu1 %v840_v62 }
 0x137   :  { %v745_v2 = vmul.f32 0.2, %v521_v63  ;;  %v524_v3 = vadd.f32 %v523_v1, %v2706_v16  ;;  %v525_v4 = vpop.f32.mrb[19].mxu0  ;;  %2203 = vmatprep.mubr.msk.bf16.mxu1 %vm2427_vm0, %v2426_v34  ;;  %vm695_vm9 = vcmp.gt.f32.partialorder %v521_v63, 0.0 }
 0x139   :  { %vm696_vm10 = vcmp.gt.f32.partialorder %v524_v3, 0.0  ;;  %v746_v5 = vmul.f32 0.2, %v524_v3  ;;  %v795_v6 = vsel %vm695_vm9, %v521_v63, %v745_v2 }
 0x13b   :  { %v796_v7 = vsel %vm696_vm10, %v524_v3, %v746_v5 }
 0x13c   :  { %v528_v8 = vpop.f32.mrb[20].mxu0  ;;  %v841_v9 = vpack.c.bf16 %v796_v7, %v795_v6 }
 0x13d   :  { %v529_v10 = vadd.f32 %v528_v8, %v2706_v16  ;;  %v530_v11 = vpop.f32.mrb[21].mxu0 }
 0x13e   :  { %v531_v12 = vpop.f32.mrb[22].mxu0  ;;  %2204 = vmatmul.mubr.bf16.gmra.mrb[16].mxu1 %v841_v9 }
 0x13f   :  { %v747_v14 = vmul.f32 0.2, %v529_v10  ;;  %v532_v17 = vadd.f32 %v531_v12, %v2706_v16  ;;  %v533_v18 = vpop.f32.mrb[23].mxu0  ;;  %2207 = vmatprep.mubr.msk.bf16.mxu1 %vm2427_vm0, %v2426_v34  ;;  %vm697_vm11 = vcmp.gt.f32.partialorder %v529_v10, 0.0 }
 0x141   :  { %vm698_vm12 = vcmp.gt.f32.partialorder %v532_v17, 0.0  ;;  %v748_v19 = vmul.f32 0.2, %v532_v17  ;;  %v797_v20 = vsel %vm697_vm11, %v529_v10, %v747_v14 }
 0x143   :  { %v798_v21 = vsel %vm698_vm12, %v532_v17, %v748_v19 }
 0x144   :  { %v536_v22 = vpop.f32.mrb[24].mxu0  ;;  %v842_v23 = vpack.c.bf16 %v798_v21, %v797_v20 }
 0x145   :  { %v537_v24 = vadd.f32 %v536_v22, %v2706_v16  ;;  %v538_v25 = vpop.f32.mrb[25].mxu0 }
 0x146   :  { %v539_v26 = vpop.f32.mrb[26].mxu0  ;;  %2208 = vmatmul.mubr.bf16.gmra.mrb[20].mxu1 %v842_v23 }
 0x147   :  { %v749_v27 = vmul.f32 0.2, %v537_v24  ;;  %v540_v28 = vadd.f32 %v539_v26, %v2706_v16  ;;  %v541_v29 = vpop.f32.mrb[27].mxu0  ;;  %2211 = vmatprep.mubr.msk.bf16.mxu1 %vm2427_vm0, %v2426_v34  ;;  %vm699_vm13 = vcmp.gt.f32.partialorder %v537_v24, 0.0 }
 0x149   :  { %vm700_vm14 = vcmp.gt.f32.partialorder %v540_v28, 0.0  ;;  %v750_v30 = vmul.f32 0.2, %v540_v28  ;;  %v799_v31 = vsel %vm699_vm13, %v537_v24, %v749_v27 }
 0x14b   :  { %v800_v32 = vsel %vm700_vm14, %v540_v28, %v750_v30 }
 0x14c   :  { %v544_v33 = vpop.f32.mrb[28].mxu0  ;;  %v843_v35 = vpack.c.bf16 %v800_v32, %v799_v31 }
 0x14d   :  { %v545_v36 = vadd.f32 %v544_v33, %v2706_v16  ;;  %v546_v37 = vpop.f32.mrb[29].mxu0 }
 0x14e   :  { %v547_v38 = vpop.f32.mrb[30].mxu0  ;;  %2212 = vmatmul.mubr.bf16.gmra.mrb[24].mxu1 %v843_v35 }
 0x14f   :  { %v751_v39 = vmul.f32 0.2, %v545_v36  ;;  %v548_v40 = vadd.f32 %v547_v38, %v2706_v16  ;;  %v549_v41 = vpop.f32.mrb[31].mxu0  ;;  %2215 = vmatprep.mubr.msk.bf16.mxu1 %vm2427_vm0, %v2426_v34  ;;  %vm701_vm15 = vcmp.gt.f32.partialorder %v545_v36, 0.0 }
 0x151   :  { %vm702_vm1 = vcmp.gt.f32.partialorder %v548_v40, 0.0  ;;  %v752_v42 = vmul.f32 0.2, %v548_v40  ;;  %v801_v43 = vsel %vm701_vm15, %v545_v36, %v751_v39 }
 0x153   :  { %v802_v44 = vsel %vm702_vm1, %v548_v40, %v752_v42 }
 0x154   :  { %v552_v45 = vpop.f32.mrb[32].mxu0  ;;  %v844_v46 = vpack.c.bf16 %v802_v44, %v801_v43 }
 0x155   :  { %v553_v47 = vadd.f32 %v552_v45, %v2706_v16  ;;  %v554_v48 = vpop.f32.mrb[33].mxu0 }
 0x156   :  { %v555_v49 = vpop.f32.mrb[34].mxu0  ;;  %2216 = vmatmul.mubr.bf16.gmra.mrb[28].mxu1 %v844_v46 }
 0x157   :  { %v753_v50 = vmul.f32 0.2, %v553_v47  ;;  %v556_v51 = vadd.f32 %v555_v49, %v2706_v16  ;;  %v557_v52 = vpop.f32.mrb[35].mxu0  ;;  %2219 = vmatprep.mubr.msk.bf16.mxu1 %vm2427_vm0, %v2426_v34  ;;  %vm703_vm2 = vcmp.gt.f32.partialorder %v553_v47, 0.0 }
 0x159   :  { %vm704_vm3 = vcmp.gt.f32.partialorder %v556_v51, 0.0  ;;  %v754_v53 = vmul.f32 0.2, %v556_v51  ;;  %v803_v54 = vsel %vm703_vm2, %v553_v47, %v753_v50 }
 0x15b   :  { %v804_v55 = vsel %vm704_vm3, %v556_v51, %v754_v53 }
 0x15c   :  { %v560_v56 = vpop.f32.mrb[36].mxu0  ;;  %v845_v57 = vpack.c.bf16 %v804_v55, %v803_v54 }
 0x15d   :  { %v561_v58 = vadd.f32 %v560_v56, %v2706_v16  ;;  %v562_v59 = vpop.f32.mrb[37].mxu0 }
 0x15e   :  { %v563_v60 = vpop.f32.mrb[38].mxu0  ;;  %2220 = vmatmul.mubr.bf16.gmra.mrb[32].mxu1 %v845_v57 }
 0x15f   :  { %v755_v61 = vmul.f32 0.2, %v561_v58  ;;  %v564_v62 = vadd.f32 %v563_v60, %v2706_v16  ;;  %v565_v63 = vpop.f32.mrb[39].mxu0  ;;  %2223 = vmatprep.mubr.msk.bf16.mxu1 %vm2427_vm0, %v2426_v34  ;;  %vm705_vm4 = vcmp.gt.f32.partialorder %v561_v58, 0.0 }
 0x161   :  { %vm706_vm5 = vcmp.gt.f32.partialorder %v564_v62, 0.0  ;;  %v756_v0 = vmul.f32 0.2, %v564_v62  ;;  %v805_v1 = vsel %vm705_vm4, %v561_v58, %v755_v61 }
 0x163   :  { %v806_v2 = vsel %vm706_vm5, %v564_v62, %v756_v0 }
 0x164   :  { %v568_v3 = vpop.f32.mrb[40].mxu0  ;;  %v846_v4 = vpack.c.bf16 %v806_v2, %v805_v1 }
 0x165   :  { %v569_v5 = vadd.f32 %v568_v3, %v2706_v16  ;;  %v570_v6 = vpop.f32.mrb[41].mxu0 }
 0x166   :  { %v571_v7 = vpop.f32.mrb[42].mxu0  ;;  %2224 = vmatmul.mubr.bf16.gmra.mrb[36].mxu1 %v846_v4 }
 0x167   :  { %v757_v8 = vmul.f32 0.2, %v569_v5  ;;  %v572_v9 = vadd.f32 %v571_v7, %v2706_v16  ;;  %v573_v10 = vpop.f32.mrb[43].mxu0  ;;  %2227 = vmatprep.mubr.msk.bf16.mxu1 %vm2427_vm0, %v2426_v34  ;;  %vm707_vm6 = vcmp.gt.f32.partialorder %v569_v5, 0.0 }
 0x169   :  { %vm708_vm7 = vcmp.gt.f32.partialorder %v572_v9, 0.0  ;;  %v758_v11 = vmul.f32 0.2, %v572_v9  ;;  %v807_v12 = vsel %vm707_vm6, %v569_v5, %v757_v8 }
 0x16b   :  { %v808_v14 = vsel %vm708_vm7, %v572_v9, %v758_v11 }
 0x16c   :  { %v576_v17 = vpop.f32.mrb[44].mxu0  ;;  %v847_v18 = vpack.c.bf16 %v808_v14, %v807_v12 }
 0x16d   :  { %v577_v19 = vadd.f32 %v576_v17, %v2706_v16  ;;  %v578_v20 = vpop.f32.mrb[45].mxu0 }
 0x16e   :  { %v579_v21 = vpop.f32.mrb[46].mxu0  ;;  %2228 = vmatmul.mubr.bf16.gmra.mrb[40].mxu1 %v847_v18 }
 0x16f   :  { %v759_v22 = vmul.f32 0.2, %v577_v19  ;;  %v580_v23 = vadd.f32 %v579_v21, %v2706_v16  ;;  %v581_v24 = vpop.f32.mrb[47].mxu0  ;;  %2231 = vmatprep.mubr.msk.bf16.mxu1 %vm2427_vm0, %v2426_v34  ;;  %vm709_vm8 = vcmp.gt.f32.partialorder %v577_v19, 0.0 }
 0x171   :  { %vm710_vm9 = vcmp.gt.f32.partialorder %v580_v23, 0.0  ;;  %v760_v25 = vmul.f32 0.2, %v580_v23  ;;  %v809_v26 = vsel %vm709_vm8, %v577_v19, %v759_v22 }
 0x173   :  { %v810_v27 = vsel %vm710_vm9, %v580_v23, %v760_v25 }
 0x174   :  { %v584_v28 = vpop.f32.mrb[48].mxu0  ;;  %v848_v29 = vpack.c.bf16 %v810_v27, %v809_v26 }
 0x175   :  { %v585_v30 = vadd.f32 %v584_v28, %v2706_v16  ;;  %v586_v31 = vpop.f32.mrb[49].mxu0 }
 0x176   :  { %v587_v32 = vpop.f32.mrb[50].mxu0  ;;  %2232 = vmatmul.mubr.bf16.gmra.mrb[44].mxu1 %v848_v29 }
 0x177   :  { %v761_v33 = vmul.f32 0.2, %v585_v30  ;;  %v588_v35 = vadd.f32 %v587_v32, %v2706_v16  ;;  %v589_v36 = vpop.f32.mrb[51].mxu0  ;;  %2235 = vmatprep.mubr.msk.bf16.mxu1 %vm2427_vm0, %v2426_v34  ;;  %vm711_vm10 = vcmp.gt.f32.partialorder %v585_v30, 0.0 }
 0x179   :  { %vm712_vm11 = vcmp.gt.f32.partialorder %v588_v35, 0.0  ;;  %v762_v37 = vmul.f32 0.2, %v588_v35  ;;  %v811_v38 = vsel %vm711_vm10, %v585_v30, %v761_v33 }
 0x17b   :  { %v812_v39 = vsel %vm712_vm11, %v588_v35, %v762_v37 }
 0x17c   :  { %v592_v40 = vpop.f32.mrb[52].mxu0  ;;  %v849_v41 = vpack.c.bf16 %v812_v39, %v811_v38 }
 0x17d   :  { %v593_v42 = vadd.f32 %v592_v40, %v2706_v16  ;;  %v594_v43 = vpop.f32.mrb[53].mxu0 }
 0x17e   :  { %v595_v44 = vpop.f32.mrb[54].mxu0  ;;  %2236 = vmatmul.mubr.bf16.gmra.mrb[48].mxu1 %v849_v41 }
 0x17f   :  { %v763_v45 = vmul.f32 0.2, %v593_v42  ;;  %v596_v46 = vadd.f32 %v595_v44, %v2706_v16  ;;  %v597_v47 = vpop.f32.mrb[55].mxu0  ;;  %2239 = vmatprep.mubr.msk.bf16.mxu1 %vm2427_vm0, %v2426_v34  ;;  %vm713_vm12 = vcmp.gt.f32.partialorder %v593_v42, 0.0 }
 0x181   :  { %vm714_vm13 = vcmp.gt.f32.partialorder %v596_v46, 0.0  ;;  %v764_v48 = vmul.f32 0.2, %v596_v46  ;;  %v813_v49 = vsel %vm713_vm12, %v593_v42, %v763_v45 }
 0x183   :  { %v814_v50 = vsel %vm714_vm13, %v596_v46, %v764_v48 }
 0x184   :  { %v600_v51 = vpop.f32.mrb[56].mxu0  ;;  %v850_v52 = vpack.c.bf16 %v814_v50, %v813_v49 }
 0x185   :  { %v601_v53 = vadd.f32 %v600_v51, %v2706_v16  ;;  %v602_v54 = vpop.f32.mrb[57].mxu0 }
 0x186   :  { %v603_v55 = vpop.f32.mrb[58].mxu0  ;;  %2240 = vmatmul.mubr.bf16.gmra.mrb[52].mxu1 %v850_v52 }
 0x187   :  { %v765_v56 = vmul.f32 0.2, %v601_v53  ;;  %v604_v57 = vadd.f32 %v603_v55, %v2706_v16  ;;  %v605_v58 = vpop.f32.mrb[59].mxu0  ;;  %2243 = vmatprep.mubr.msk.bf16.mxu1 %vm2427_vm0, %v2426_v34  ;;  %vm715_vm14 = vcmp.gt.f32.partialorder %v601_v53, 0.0 }
 0x189   :  { %vm716_vm15 = vcmp.gt.f32.partialorder %v604_v57, 0.0  ;;  %v766_v59 = vmul.f32 0.2, %v604_v57  ;;  %v815_v60 = vsel %vm715_vm14, %v601_v53, %v765_v56 }
 0x18b   :  { %v816_v61 = vsel %vm716_vm15, %v604_v57, %v766_v59 }
 0x18c   :  { %v608_v62 = vpop.f32.mrb[60].mxu0  ;;  %v851_v63 = vpack.c.bf16 %v816_v61, %v815_v60 }
 0x18d   :  { %v609_v0 = vadd.f32 %v608_v62, %v2706_v16  ;;  %v610_v1 = vpop.f32.mrb[61].mxu0 }
 0x18e   :  { %v611_v2 = vpop.f32.mrb[62].mxu0  ;;  %2244 = vmatmul.mubr.bf16.gmra.mrb[56].mxu1 %v851_v63 }
 0x18f   :  { %v767_v3 = vmul.f32 0.2, %v609_v0  ;;  %v612_v4 = vadd.f32 %v611_v2, %v2706_v16  ;;  %v613_v5 = vpop.f32.mrb[63].mxu0  ;;  %2247 = vmatprep.mubr.msk.bf16.mxu1 %vm2427_vm0, %v2426_v34  ;;  %vm717_vm1 = vcmp.gt.f32.partialorder %v609_v0, 0.0 }
 0x191   :  { %vm718_vm2 = vcmp.gt.f32.partialorder %v612_v4, 0.0  ;;  %v768_v6 = vmul.f32 0.2, %v612_v4  ;;  %v817_v7 = vsel %vm717_vm1, %v609_v0, %v767_v3 }
 0x193   :  { %v818_v8 = vsel %vm718_vm2, %v612_v4, %v768_v6 }
 0x194   :  { %v616_v9 = vpop.f32.mrb[64].mxu0  ;;  %v852_v10 = vpack.c.bf16 %v818_v8, %v817_v7 }
 0x195   :  { %v617_v11 = vadd.f32 %v616_v9, %v2706_v16  ;;  %v618_v12 = vpop.f32.mrb[65].mxu0 }
 0x196   :  { %v619_v14 = vpop.f32.mrb[66].mxu0  ;;  %2248 = vmatmul.mubr.bf16.gmra.mrb[60].mxu1 %v852_v10 }
 0x197   :  { %v769_v17 = vmul.f32 0.2, %v617_v11  ;;  %v620_v18 = vadd.f32 %v619_v14, %v2706_v16  ;;  %v621_v19 = vpop.f32.mrb[67].mxu0  ;;  %2251 = vmatprep.mubr.msk.bf16.mxu1 %vm2427_vm0, %v2426_v34  ;;  %vm719_vm3 = vcmp.gt.f32.partialorder %v617_v11, 0.0 }
 0x199   :  { %vm720_vm4 = vcmp.gt.f32.partialorder %v620_v18, 0.0  ;;  %v770_v20 = vmul.f32 0.2, %v620_v18  ;;  %v819_v21 = vsel %vm719_vm3, %v617_v11, %v769_v17 }
 0x19b   :  { %v820_v22 = vsel %vm720_vm4, %v620_v18, %v770_v20 }
 0x19c   :  { %v624_v23 = vpop.f32.mrb[68].mxu0  ;;  %v853_v24 = vpack.c.bf16 %v820_v22, %v819_v21 }
 0x19d   :  { %v625_v25 = vadd.f32 %v624_v23, %v2706_v16  ;;  %v626_v26 = vpop.f32.mrb[69].mxu0 }
 0x19e   :  { %v627_v27 = vpop.f32.mrb[70].mxu0  ;;  %2252 = vmatmul.mubr.bf16.gmra.mrb[64].mxu1 %v853_v24 }
 0x19f   :  { %v771_v28 = vmul.f32 0.2, %v625_v25  ;;  %v628_v29 = vadd.f32 %v627_v27, %v2706_v16  ;;  %v629_v30 = vpop.f32.mrb[71].mxu0  ;;  %2255 = vmatprep.mubr.msk.bf16.mxu1 %vm2427_vm0, %v2426_v34  ;;  %vm721_vm5 = vcmp.gt.f32.partialorder %v625_v25, 0.0 }
 0x1a1   :  { %vm722_vm6 = vcmp.gt.f32.partialorder %v628_v29, 0.0  ;;  %v772_v31 = vmul.f32 0.2, %v628_v29  ;;  %v821_v32 = vsel %vm721_vm5, %v625_v25, %v771_v28 }
 0x1a3   :  { %v822_v33 = vsel %vm722_vm6, %v628_v29, %v772_v31 }
 0x1a4   :  { %v632_v35 = vpop.f32.mrb[72].mxu0  ;;  %v854_v36 = vpack.c.bf16 %v822_v33, %v821_v32 }
 0x1a5   :  { %v633_v37 = vadd.f32 %v632_v35, %v2706_v16  ;;  %v634_v38 = vpop.f32.mrb[73].mxu0 }
 0x1a6   :  { %v635_v39 = vpop.f32.mrb[74].mxu0  ;;  %2256 = vmatmul.mubr.bf16.gmra.mrb[68].mxu1 %v854_v36 }
 0x1a7   :  { %v773_v40 = vmul.f32 0.2, %v633_v37  ;;  %v636_v41 = vadd.f32 %v635_v39, %v2706_v16  ;;  %v637_v42 = vpop.f32.mrb[75].mxu0  ;;  %2259 = vmatprep.mubr.msk.bf16.mxu1 %vm2427_vm0, %v2426_v34  ;;  %vm723_vm7 = vcmp.gt.f32.partialorder %v633_v37, 0.0 }
 0x1a9   :  { %vm724_vm8 = vcmp.gt.f32.partialorder %v636_v41, 0.0  ;;  %v774_v43 = vmul.f32 0.2, %v636_v41  ;;  %v823_v44 = vsel %vm723_vm7, %v633_v37, %v773_v40 }
 0x1ab   :  { %v824_v45 = vsel %vm724_vm8, %v636_v41, %v774_v43 }
 0x1ac   :  { %v640_v46 = vpop.f32.mrb[76].mxu0  ;;  %v855_v47 = vpack.c.bf16 %v824_v45, %v823_v44 }
 0x1ad   :  { %v641_v48 = vadd.f32 %v640_v46, %v2706_v16  ;;  %v642_v49 = vpop.f32.mrb[77].mxu0 }
 0x1ae   :  { %v643_v50 = vpop.f32.mrb[78].mxu0  ;;  %2260 = vmatmul.mubr.bf16.gmra.mrb[72].mxu1 %v855_v47 }
 0x1af   :  { %v775_v51 = vmul.f32 0.2, %v641_v48  ;;  %v644_v52 = vadd.f32 %v643_v50, %v2706_v16  ;;  %v645_v53 = vpop.f32.mrb[79].mxu0  ;;  %2263 = vmatprep.mubr.msk.bf16.mxu1 %vm2427_vm0, %v2426_v34  ;;  %vm725_vm9 = vcmp.gt.f32.partialorder %v641_v48, 0.0 }
 0x1b1   :  { %vm726_vm10 = vcmp.gt.f32.partialorder %v644_v52, 0.0  ;;  %v776_v54 = vmul.f32 0.2, %v644_v52  ;;  %v825_v55 = vsel %vm725_vm9, %v641_v48, %v775_v51 }
 0x1b3   :  { %v826_v56 = vsel %vm726_vm10, %v644_v52, %v776_v54  ;;  %v880_v54 = vsub.s32 1, %v2697_v13 }
 0x1b4   :  { %v648_v57 = vpop.f32.mrb[80].mxu0  ;;  %v856_v58 = vpack.c.bf16 %v826_v56, %v825_v55 }
 0x1b5   :  { %v649_v59 = vadd.f32 %v648_v57, %v2706_v16  ;;  %v650_v60 = vpop.f32.mrb[81].mxu0 }
 0x1b6   :  { %v651_v61 = vpop.f32.mrb[82].mxu0  ;;  %2264 = vmatmul.mubr.bf16.gmra.mrb[76].mxu1 %v856_v58  ;;  %v2808_v58 = vrot.slane %v2703_v15, %v880_v54 }
 0x1b7   :  { %v777_v62 = vmul.f32 0.2, %v649_v59  ;;  %v652_v63 = vadd.f32 %v651_v61, %v2706_v16  ;;  %v653_v0 = vpop.f32.mrb[83].mxu0  ;;  %2267 = vmatprep.mubr.msk.bf16.mxu1 %vm2427_vm0, %v2426_v34  ;;  %vm727_vm11 = vcmp.gt.f32.partialorder %v649_v59, 0.0 }
 0x1b9   :  { %vm728_vm12 = vcmp.gt.f32.partialorder %v652_v63, 0.0  ;;  %v778_v1 = vmul.f32 0.2, %v652_v63  ;;  %v827_v2 = vsel %vm727_vm11, %v649_v59, %v777_v62 }
 0x1bb   :  { %v828_v3 = vsel %vm728_vm12, %v652_v63, %v778_v1 }
 0x1bc   :  { %v656_v4 = vpop.f32.mrb[84].mxu0  ;;  %v857_v5 = vpack.c.bf16 %v828_v3, %v827_v2 }
 0x1bd   :  { %v657_v6 = vadd.f32 %v656_v4, %v2706_v16  ;;  %v658_v7 = vpop.f32.mrb[85].mxu0 }
 0x1be   :  { %v659_v8 = vpop.f32.mrb[86].mxu0  ;;  %2268 = vmatmul.mubr.bf16.gmra.mrb[80].mxu1 %v857_v5 }
 0x1bf   :  { %v779_v9 = vmul.f32 0.2, %v657_v6  ;;  %v660_v10 = vadd.f32 %v659_v8, %v2706_v16  ;;  %v661_v11 = vpop.f32.mrb[87].mxu0  ;;  %2271 = vmatprep.mubr.msk.bf16.mxu1 %vm2427_vm0, %v2426_v34  ;;  %vm729_vm13 = vcmp.gt.f32.partialorder %v657_v6, 0.0 }
 0x1c1   :  { %vm730_vm14 = vcmp.gt.f32.partialorder %v660_v10, 0.0  ;;  %v780_v12 = vmul.f32 0.2, %v660_v10  ;;  %v829_v14 = vsel %vm729_vm13, %v657_v6, %v779_v9 }
 0x1c3   :  { %v830_v17 = vsel %vm730_vm14, %v660_v10, %v780_v12 }
 0x1c4   :  { %v664_v18 = vpop.f32.mrb[88].mxu0  ;;  %v858_v19 = vpack.c.bf16 %v830_v17, %v829_v14 }
 0x1c5   :  { %v665_v20 = vadd.f32 %v664_v18, %v2706_v16  ;;  %v666_v21 = vpop.f32.mrb[89].mxu0 }
 0x1c6   :  { %v667_v22 = vpop.f32.mrb[90].mxu0  ;;  %2272 = vmatmul.mubr.bf16.gmra.mrb[84].mxu1 %v858_v19 }
 0x1c7   :  { %v781_v23 = vmul.f32 0.2, %v665_v20  ;;  %v668_v24 = vadd.f32 %v667_v22, %v2706_v16  ;;  %v669_v25 = vpop.f32.mrb[91].mxu0  ;;  %2275 = vmatprep.mubr.msk.bf16.mxu1 %vm2427_vm0, %v2426_v34  ;;  %vm731_vm15 = vcmp.gt.f32.partialorder %v665_v20, 0.0 }
 0x1c9   :  { %vm732_vm1 = vcmp.gt.f32.partialorder %v668_v24, 0.0  ;;  %v782_v26 = vmul.f32 0.2, %v668_v24  ;;  %v831_v27 = vsel %vm731_vm15, %v665_v20, %v781_v23 }
 0x1cb   :  { %v832_v28 = vsel %vm732_vm1, %v668_v24, %v782_v26 }
 0x1cc   :  { %v672_v29 = vpop.f32.mrb[92].mxu0  ;;  %v859_v30 = vpack.c.bf16 %v832_v28, %v831_v27 }
 0x1cd   :  { %v673_v31 = vadd.f32 %v672_v29, %v2706_v16  ;;  %v674_v32 = vpop.f32.mrb[93].mxu0 }
 0x1ce   :  { %v675_v33 = vpop.f32.mrb[94].mxu0  ;;  %2276 = vmatmul.mubr.bf16.gmra.mrb[88].mxu1 %v859_v30 }
 0x1cf   :  { %v783_v35 = vmul.f32 0.2, %v673_v31  ;;  %v676_v36 = vadd.f32 %v675_v33, %v2706_v16  ;;  %v677_v37 = vpop.f32.mrb[95].mxu0  ;;  %2279 = vmatprep.mubr.msk.bf16.mxu1 %vm2427_vm0, %v2426_v34  ;;  %vm733_vm2 = vcmp.gt.f32.partialorder %v673_v31, 0.0 }
 0x1d1   :  { %vm734_vm3 = vcmp.gt.f32.partialorder %v676_v36, 0.0  ;;  %v784_v38 = vmul.f32 0.2, %v676_v36  ;;  %v833_v39 = vsel %vm733_vm2, %v673_v31, %v783_v35 }
 0x1d3   :  { %v834_v40 = vsel %vm734_vm3, %v676_v36, %v784_v38 }
 0x1d4   :  { %v680_v41 = vpop.f32.mrb[96].mxu0  ;;  %v860_v42 = vpack.c.bf16 %v834_v40, %v833_v39 }
 0x1d5   :  { %v681_v43 = vadd.f32 %v680_v41, %v2706_v16  ;;  %v682_v44 = vpop.f32.mrb[97].mxu0 }
 0x1d6   :  { %v683_v45 = vpop.f32.mrb[98].mxu0  ;;  %2280 = vmatmul.mubr.bf16.gmra.mrb[92].mxu1 %v860_v42 }
 0x1d7   :  { %v785_v46 = vmul.f32 0.2, %v681_v43  ;;  %v684_v47 = vadd.f32 %v683_v45, %v2706_v16  ;;  %v685_v48 = vpop.f32.mrb[99].mxu0  ;;  %2283 = vmatprep.mubr.msk.bf16.mxu1 %vm2427_vm0, %v2426_v34  ;;  %vm735_vm4 = vcmp.gt.f32.partialorder %v681_v43, 0.0  ;;  %vm1163_vm0 = vcmask 130048  }
 0x1d9   :  { %vm736_vm5 = vcmp.gt.f32.partialorder %v684_v47, 0.0  ;;  %v786_v49 = vmul.f32 0.2, %v684_v47  ;;  %v835_v50 = vsel %vm735_vm4, %v681_v43, %v785_v46 }
 0x1db   :  { %v836_v51 = vsel %vm736_vm5, %v684_v47, %v786_v49 }
 0x1dc   :  { %v861_v52 = vpack.c.bf16 %v836_v51, %v835_v50 }
 0x1de   :  { %2284 = vmatmul.mubr.bf16.gmra.mrb[96].mxu1 %v861_v52 }
 0x1f1   :  { %v964_v53 = vpop.f32.mrb[0].mxu1 }
 0x1f2   :  { %v2189_v55 = vpop.f32.mrb[1].mxu1  ;;  %v2814_v59 = vadd.f32 %v964_v53, %v2808_v58 }
 0x1f3   :  { %v967_v56 = vpop.f32.mrb[2].mxu1 }
 0x1f4   :  { %v2190_v57 = vpop.f32.mrb[3].mxu1  ;;  %v2811_v16 = vadd.f32 %v967_v56, %v2808_v58  ;;  %v1270_v15 = vmul.f32 %v2814_v59, %v2814_v59  ;;  %v1164_v4 = vsel %vm1163_vm0, %v2814_v59, 0.0 }
 0x1f6   :  { %v1271_v63 = vmul.f32 %v2811_v16, %v2811_v16  ;;  %v1165_v1 = vsel %vm1163_vm0, %v2811_v16, 0.0  ;;  %v1320_v9 = vsel %vm1163_vm0, %v1270_v15, 0.0 }
 0x1f7   :  { %v1166_v7 = vadd.f32 %v1165_v1, %v1164_v4 }
 0x1f8   :  { %v1321_v5 = vsel %vm1163_vm0, %v1271_v63, 0.0 }
 0x1f9   :  { %v972_v34 = vpop.f32.mrb[4].mxu1  ;;  %v1322_v17 = vadd.f32 %v1321_v5, %v1320_v9 }
 0x1fa   :  { %v2817_v60 = vadd.f32 %v972_v34, %v2808_v58  ;;  %v2193_v61 = vpop.f32.mrb[5].mxu1 }
 0x1fb   :  { %v975_v62 = vpop.f32.mrb[6].mxu1 }
 0x1fc   :  { %v2194_v0 = vpop.f32.mrb[7].mxu1  ;;  %v1272_v2 = vmul.f32 %v2817_v60, %v2817_v60  ;;  %v2828_v3 = vadd.f32 %v975_v62, %v2808_v58  ;;  %v1167_v6 = vsel %vm1163_vm0, %v2817_v60, 0.0 }
 0x1fd   :  { %v1168_v18 = vadd.f32 %v1167_v6, %v1166_v7 }
 0x1fe   :  { %v1323_v10 = vsel %vm1163_vm0, %v1272_v2, 0.0  ;;  %v1273_v11 = vmul.f32 %v2828_v3, %v2828_v3  ;;  %v1169_v20 = vsel %vm1163_vm0, %v2828_v3, 0.0 }
 0x1ff   :  { %v1324_v24 = vadd.f32 %v1323_v10, %v1322_v17  ;;  %v1170_v27 = vadd.f32 %v1169_v20, %v1168_v18 }
 0x200   :  { %v1325_v25 = vsel %vm1163_vm0, %v1273_v11, 0.0 }
 0x201   :  { %v980_v8 = vpop.f32.mrb[8].mxu1  ;;  %v1326_v30 = vadd.f32 %v1325_v25, %v1324_v24 }
 0x202   :  { %v2840_v12 = vadd.f32 %v980_v8, %v2808_v58  ;;  %v2197_v14 = vpop.f32.mrb[9].mxu1 }
 0x203   :  { %v983_v19 = vpop.f32.mrb[10].mxu1 }
 0x204   :  { %v1274_v21 = vmul.f32 %v2840_v12, %v2840_v12  ;;  %v2847_v22 = vadd.f32 %v983_v19, %v2808_v58  ;;  %v2198_v23 = vpop.f32.mrb[11].mxu1  ;;  %v1171_v26 = vsel %vm1163_vm0, %v2840_v12, 0.0 }
 0x205   :  { %v1172_v31 = vadd.f32 %v1171_v26, %v1170_v27 }
 0x206   :  { %v1327_v28 = vsel %vm1163_vm0, %v1274_v21, 0.0  ;;  %v1275_v29 = vmul.f32 %v2847_v22, %v2847_v22  ;;  %v1173_v33 = vsel %vm1163_vm0, %v2847_v22, 0.0 }
 0x207   :  { %v1328_v37 = vadd.f32 %v1327_v28, %v1326_v30  ;;  %v1174_v44 = vadd.f32 %v1173_v33, %v1172_v31 }
 0x208   :  { %v1329_v39 = vsel %vm1163_vm0, %v1275_v29, 0.0 }
 0x209   :  { %v988_v32 = vpop.f32.mrb[12].mxu1  ;;  %v1330_v47 = vadd.f32 %v1329_v39, %v1328_v37 }
 0x20a   :  { %v2858_v35 = vadd.f32 %v988_v32, %v2808_v58  ;;  %v2201_v36 = vpop.f32.mrb[13].mxu1 }
 0x20b   :  { %v991_v38 = vpop.f32.mrb[14].mxu1 }
 0x20c   :  { %v1175_v40 = vsel %vm1163_vm0, %v2858_v35, 0.0  ;;  %v1276_v41 = vmul.f32 %v2858_v35, %v2858_v35  ;;  %v2866_v42 = vadd.f32 %v991_v38, %v2808_v58  ;;  %v2202_v43 = vpop.f32.mrb[15].mxu1 }
 0x20d   :  { %v1176_v48 = vadd.f32 %v1175_v40, %v1174_v44 }
 0x20e   :  { %v1331_v45 = vsel %vm1163_vm0, %v1276_v41, 0.0  ;;  %v1277_v46 = vmul.f32 %v2866_v42, %v2866_v42  ;;  %v1177_v49 = vsel %vm1163_vm0, %v2866_v42, 0.0 }
 0x20f   :  { %v1332_v50 = vadd.f32 %v1331_v45, %v1330_v47  ;;  %v1178_v55 = vadd.f32 %v1177_v49, %v1176_v48 }
 0x210   :  { %v1333_v52 = vsel %vm1163_vm0, %v1277_v46, 0.0 }
 0x211   :  { %v996_v51 = vpop.f32.mrb[16].mxu1  ;;  %v1334_v0 = vadd.f32 %v1333_v52, %v1332_v50 }
 0x212   :  { %v997_v53 = vadd.f32 %v996_v51, %v2808_v58  ;;  %v2205_v54 = vpop.f32.mrb[17].mxu1 }
 0x213   :  { %v999_v56 = vpop.f32.mrb[18].mxu1 }
 0x214   :  { %v1179_v57 = vsel %vm1163_vm0, %v997_v53, 0.0  ;;  %v1278_v34 = vmul.f32 %v997_v53, %v997_v53  ;;  %v1000_v61 = vadd.f32 %v999_v56, %v2808_v58  ;;  %v2206_v62 = vpop.f32.mrb[19].mxu1 }
 0x215   :  { %v1180_v63 = vadd.f32 %v1179_v57, %v1178_v55 }
 0x216   :  { %v1335_v15 = vsel %vm1163_vm0, %v1278_v34, 0.0  ;;  %v1181_v1 = vsel %vm1163_vm0, %v1000_v61, 0.0  ;;  %v1279_v2 = vmul.f32 %v1000_v61, %v1000_v61 }
 0x217   :  { %v1336_v4 = vadd.f32 %v1335_v15, %v1334_v0  ;;  %v1182_v5 = vadd.f32 %v1181_v1, %v1180_v63 }
 0x218   :  { %v1337_v6 = vsel %vm1163_vm0, %v1279_v2, 0.0 }
 0x219   :  { %v1338_v7 = vadd.f32 %v1337_v6, %v1336_v4  ;;  %v1004_v8 = vpop.f32.mrb[20].mxu1 }
 0x21a   :  { %v2209_v9 = vpop.f32.mrb[21].mxu1  ;;  %v2881_v11 = vadd.f32 %v1004_v8, %v2808_v58 }
 0x21b   :  { %v1007_v10 = vpop.f32.mrb[22].mxu1 }
 0x21c   :  { %v2210_v14 = vpop.f32.mrb[23].mxu1  ;;  %v1280_v17 = vmul.f32 %v2881_v11, %v2881_v11  ;;  %v2886_v18 = vadd.f32 %v1007_v10, %v2808_v58  ;;  %v1183_v20 = vsel %vm1163_vm0, %v2881_v11, 0.0 }
 0x21d   :  { %v1184_v28 = vadd.f32 %v1183_v20, %v1182_v5 }
 0x21e   :  { %v1339_v25 = vsel %vm1163_vm0, %v1280_v17, 0.0  ;;  %v1281_v26 = vmul.f32 %v2886_v18, %v2886_v18  ;;  %v1185_v29 = vsel %vm1163_vm0, %v2886_v18, 0.0 }
 0x21f   :  { %v1340_v32 = vadd.f32 %v1339_v25, %v1338_v7  ;;  %v1186_v37 = vadd.f32 %v1185_v29, %v1184_v28 }
 0x220   :  { %v1341_v33 = vsel %vm1163_vm0, %v1281_v26, 0.0 }
 0x221   :  { %v1012_v19 = vpop.f32.mrb[24].mxu1  ;;  %v1342_v44 = vadd.f32 %v1341_v33, %v1340_v32 }
 0x222   :  { %v2891_v21 = vadd.f32 %v1012_v19, %v2808_v58  ;;  %v2213_v23 = vpop.f32.mrb[25].mxu1 }
 0x223   :  { %v1015_v24 = vpop.f32.mrb[26].mxu1 }
 0x224   :  { %v2214_v27 = vpop.f32.mrb[27].mxu1  ;;  %v1282_v30 = vmul.f32 %v2891_v21, %v2891_v21  ;;  %v2901_v31 = vadd.f32 %v1015_v24, %v2808_v58  ;;  %v1187_v36 = vsel %vm1163_vm0, %v2891_v21, 0.0 }
 0x225   :  { %v1188_v45 = vadd.f32 %v1187_v36, %v1186_v37 }
 0x226   :  { %v1343_v39 = vsel %vm1163_vm0, %v1282_v30, 0.0  ;;  %v1283_v40 = vmul.f32 %v2901_v31, %v2901_v31  ;;  %v1189_v47 = vsel %vm1163_vm0, %v2901_v31, 0.0 }
 0x227   :  { %v1344_v51 = vadd.f32 %v1343_v39, %v1342_v44  ;;  %v1190_v54 = vadd.f32 %v1189_v47, %v1188_v45 }
 0x228   :  { %v1345_v52 = vsel %vm1163_vm0, %v1283_v40, 0.0 }
 0x229   :  { %v1020_v38 = vpop.f32.mrb[28].mxu1  ;;  %v1346_v57 = vadd.f32 %v1345_v52, %v1344_v51 }
 0x22a   :  { %v2910_v41 = vadd.f32 %v1020_v38, %v2808_v58  ;;  %v2217_v43 = vpop.f32.mrb[29].mxu1 }
 0x22b   :  { %v1023_v46 = vpop.f32.mrb[30].mxu1 }
 0x22c   :  { %v1284_v48 = vmul.f32 %v2910_v41, %v2910_v41  ;;  %v2917_v49 = vadd.f32 %v1023_v46, %v2808_v58  ;;  %v2218_v50 = vpop.f32.mrb[31].mxu1  ;;  %v1191_v53 = vsel %vm1163_vm0, %v2910_v41, 0.0 }
 0x22d   :  { %v1192_v34 = vadd.f32 %v1191_v53, %v1190_v54 }
 0x22e   :  { %v1347_v55 = vsel %vm1163_vm0, %v1284_v48, 0.0  ;;  %v1285_v56 = vmul.f32 %v2917_v49, %v2917_v49  ;;  %v1193_v62 = vsel %vm1163_vm0, %v2917_v49, 0.0 }
 0x22f   :  { %v1348_v15 = vadd.f32 %v1347_v55, %v1346_v57  ;;  %v1194_v8 = vadd.f32 %v1193_v62, %v1192_v34 }
 0x230   :  { %v1349_v2 = vsel %vm1163_vm0, %v1285_v56, 0.0 }
 0x231   :  { %v1028_v61 = vpop.f32.mrb[32].mxu1  ;;  %v1350_v14 = vadd.f32 %v1349_v2, %v1348_v15 }
 0x232   :  { %v2928_v63 = vadd.f32 %v1028_v61, %v2808_v58  ;;  %v2221_v0 = vpop.f32.mrb[33].mxu1 }
 0x233   :  { %v1031_v1 = vpop.f32.mrb[34].mxu1 }
 0x234   :  { %v1195_v4 = vsel %vm1163_vm0, %v2928_v63, 0.0  ;;  %v1286_v5 = vmul.f32 %v2928_v63, %v2928_v63  ;;  %v2936_v6 = vadd.f32 %v1031_v1, %v2808_v58  ;;  %v2222_v7 = vpop.f32.mrb[35].mxu1 }
 0x235   :  { %v1196_v17 = vadd.f32 %v1195_v4, %v1194_v8 }
 0x236   :  { %v1351_v9 = vsel %vm1163_vm0, %v1286_v5, 0.0  ;;  %v1287_v10 = vmul.f32 %v2936_v6, %v2936_v6  ;;  %v1197_v19 = vsel %vm1163_vm0, %v2936_v6, 0.0 }
 0x237   :  { %v1352_v20 = vadd.f32 %v1351_v9, %v1350_v14  ;;  %v1198_v27 = vadd.f32 %v1197_v19, %v1196_v17 }
 0x238   :  { %v1353_v24 = vsel %vm1163_vm0, %v1287_v10, 0.0 }
 0x239   :  { %v1036_v23 = vpop.f32.mrb[36].mxu1  ;;  %v1354_v37 = vadd.f32 %v1353_v24, %v1352_v20 }
 0x23a   :  { %v1037_v25 = vadd.f32 %v1036_v23, %v2808_v58  ;;  %v2225_v26 = vpop.f32.mrb[37].mxu1 }
 0x23b   :  { %v1039_v28 = vpop.f32.mrb[38].mxu1 }
 0x23c   :  { %v1199_v29 = vsel %vm1163_vm0, %v1037_v25, 0.0  ;;  %v1288_v30 = vmul.f32 %v1037_v25, %v1037_v25  ;;  %v1040_v32 = vadd.f32 %v1039_v28, %v2808_v58  ;;  %v2226_v33 = vpop.f32.mrb[39].mxu1 }
 0x23d   :  { %v1200_v36 = vadd.f32 %v1199_v29, %v1198_v27 }
 0x23e   :  { %v1355_v38 = vsel %vm1163_vm0, %v1288_v30, 0.0  ;;  %v1201_v39 = vsel %vm1163_vm0, %v1040_v32, 0.0  ;;  %v1289_v40 = vmul.f32 %v1040_v32, %v1040_v32 }
 0x23f   :  { %v1356_v43 = vadd.f32 %v1355_v38, %v1354_v37  ;;  %v1202_v44 = vadd.f32 %v1201_v39, %v1200_v36 }
 0x240   :  { %v1357_v45 = vsel %vm1163_vm0, %v1289_v40, 0.0 }
 0x241   :  { %v1358_v46 = vadd.f32 %v1357_v45, %v1356_v43  ;;  %v1044_v47 = vpop.f32.mrb[40].mxu1 }
 0x242   :  { %v2229_v48 = vpop.f32.mrb[41].mxu1  ;;  %v2951_v51 = vadd.f32 %v1044_v47, %v2808_v58 }
 0x243   :  { %v1047_v50 = vpop.f32.mrb[42].mxu1 }
 0x244   :  { %v2230_v52 = vpop.f32.mrb[43].mxu1  ;;  %v1290_v53 = vmul.f32 %v2951_v51, %v2951_v51  ;;  %v2956_v54 = vadd.f32 %v1047_v50, %v2808_v58  ;;  %v1203_v56 = vsel %vm1163_vm0, %v2951_v51, 0.0 }
 0x245   :  { %v1204_v1 = vadd.f32 %v1203_v56, %v1202_v44 }
 0x246   :  { %v1359_v62 = vsel %vm1163_vm0, %v1290_v53, 0.0  ;;  %v1291_v0 = vmul.f32 %v2956_v54, %v2956_v54  ;;  %v1205_v2 = vsel %vm1163_vm0, %v2956_v54, 0.0 }
 0x247   :  { %v1360_v7 = vadd.f32 %v1359_v62, %v1358_v46  ;;  %v1206_v10 = vadd.f32 %v1205_v2, %v1204_v1 }
 0x248   :  { %v1361_v8 = vsel %vm1163_vm0, %v1291_v0, 0.0 }
 0x249   :  { %v1052_v55 = vpop.f32.mrb[44].mxu1  ;;  %v1362_v24 = vadd.f32 %v1361_v8, %v1360_v7 }
 0x24a   :  { %v2961_v57 = vadd.f32 %v1052_v55, %v2808_v58  ;;  %v2233_v34 = vpop.f32.mrb[45].mxu1 }
 0x24b   :  { %v1055_v61 = vpop.f32.mrb[46].mxu1 }
 0x24c   :  { %v2234_v15 = vpop.f32.mrb[47].mxu1  ;;  %v1292_v4 = vmul.f32 %v2961_v57, %v2961_v57  ;;  %v2971_v5 = vadd.f32 %v1055_v61, %v2808_v58  ;;  %v1207_v9 = vsel %vm1163_vm0, %v2961_v57, 0.0 }
 0x24d   :  { %v1208_v25 = vadd.f32 %v1207_v9, %v1206_v10 }
 0x24e   :  { %v1363_v17 = vsel %vm1163_vm0, %v1292_v4, 0.0  ;;  %v1293_v19 = vmul.f32 %v2971_v5, %v2971_v5  ;;  %v1209_v27 = vsel %vm1163_vm0, %v2971_v5, 0.0 }
 0x24f   :  { %v1364_v32 = vadd.f32 %v1363_v17, %v1362_v24  ;;  %v1210_v37 = vadd.f32 %v1209_v27, %v1208_v25 }
 0x250   :  { %v1365_v33 = vsel %vm1163_vm0, %v1293_v19, 0.0 }
 0x251   :  { %v1060_v14 = vpop.f32.mrb[48].mxu1  ;;  %v1366_v40 = vadd.f32 %v1365_v33, %v1364_v32 }
 0x252   :  { %v2980_v20 = vadd.f32 %v1060_v14, %v2808_v58  ;;  %v2237_v23 = vpop.f32.mrb[49].mxu1 }
 0x253   :  { %v1063_v26 = vpop.f32.mrb[50].mxu1 }
 0x254   :  { %v1294_v28 = vmul.f32 %v2980_v20, %v2980_v20  ;;  %v2987_v29 = vadd.f32 %v1063_v26, %v2808_v58  ;;  %v2238_v30 = vpop.f32.mrb[51].mxu1  ;;  %v1211_v36 = vsel %vm1163_vm0, %v2980_v20, 0.0 }
 0x255   :  { %v1212_v43 = vadd.f32 %v1211_v36, %v1210_v37 }
 0x256   :  { %v1367_v38 = vsel %vm1163_vm0, %v1294_v28, 0.0  ;;  %v1295_v39 = vmul.f32 %v2987_v29, %v2987_v29  ;;  %v1213_v45 = vsel %vm1163_vm0, %v2987_v29, 0.0 }
 0x257   :  { %v1368_v48 = vadd.f32 %v1367_v38, %v1366_v40  ;;  %v1214_v61 = vadd.f32 %v1213_v45, %v1212_v43  ;;  %v2396_v38 = vld [vmem:[%s3422_s3 + $0x40] sm:$0xff]  }
 0x258   :  { %v1369_v52 = vsel %vm1163_vm0, %v1295_v39, 0.0  ;;  %v2397_v43 = vld [vmem:[%s3422_s3] sm:$0xff]   ;;  %2149 = vmatprep.subr.bf16.mxu1 %v2396_v38 }
 0x259   :  { %v1068_v44 = vpop.f32.mrb[52].mxu1  ;;  %v1370_v15 = vadd.f32 %v1369_v52, %v1368_v48  ;;  %2150 = vmatpush3.bf16.msra.mxu1 %v2397_v43  ;;  %v2399_v52 = vld [vmem:[%s3422_s3 + $0x8] sm:$0xff]  }
 0x25a   :  { %v2998_v46 = vadd.f32 %v1068_v44, %v2808_v58  ;;  %v2241_v47 = vpop.f32.mrb[53].mxu1 }
 0x25b   :  { %v1071_v50 = vpop.f32.mrb[54].mxu1 }
 0x25c   :  { %v1215_v53 = vsel %vm1163_vm0, %v2998_v46, 0.0  ;;  %v1296_v55 = vmul.f32 %v2998_v46, %v2998_v46  ;;  %v3006_v56 = vadd.f32 %v1071_v50, %v2808_v58  ;;  %v2242_v34 = vpop.f32.mrb[55].mxu1  ;;  %v2398_v50 = vld [vmem:[%s3422_s3 + $0x48] sm:$0xff]  }
 0x25d   :  { %v1216_v1 = vadd.f32 %v1215_v53, %v1214_v61  ;;  %2151 = vmatprep.subr.bf16.mxu1 %v2398_v50 }
 0x25e   :  { %v1371_v62 = vsel %vm1163_vm0, %v1296_v55, 0.0  ;;  %v1297_v0 = vmul.f32 %v3006_v56, %v3006_v56  ;;  %v1217_v2 = vsel %vm1163_vm0, %v3006_v56, 0.0  ;;  %2152 = vmatpush3.bf16.msra.mxu1 %v2399_v52 }
 0x25f   :  { %v1372_v4 = vadd.f32 %v1371_v62, %v1370_v15  ;;  %v1218_v14 = vadd.f32 %v1217_v2, %v1216_v1 }
 0x260   :  { %v1373_v8 = vsel %vm1163_vm0, %v1297_v0, 0.0 }
 0x261   :  { %v1076_v7 = vpop.f32.mrb[56].mxu1  ;;  %v1374_v27 = vadd.f32 %v1373_v8, %v1372_v4 }
 0x262   :  { %v1077_v9 = vadd.f32 %v1076_v7, %v2808_v58  ;;  %v2245_v10 = vpop.f32.mrb[57].mxu1 }
 0x263   :  { %v1079_v17 = vpop.f32.mrb[58].mxu1 }
 0x264   :  { %v1219_v19 = vsel %vm1163_vm0, %v1077_v9, 0.0  ;;  %v1298_v23 = vmul.f32 %v1077_v9, %v1077_v9  ;;  %v1080_v24 = vadd.f32 %v1079_v17, %v2808_v58  ;;  %v2246_v25 = vpop.f32.mrb[59].mxu1 }
 0x265   :  { %v1220_v26 = vadd.f32 %v1219_v19, %v1218_v14 }
 0x266   :  { %v1375_v28 = vsel %vm1163_vm0, %v1298_v23, 0.0  ;;  %v1221_v30 = vsel %vm1163_vm0, %v1080_v24, 0.0  ;;  %v1299_v32 = vmul.f32 %v1080_v24, %v1080_v24 }
 0x267   :  { %v1376_v33 = vadd.f32 %v1375_v28, %v1374_v27  ;;  %v1222_v36 = vadd.f32 %v1221_v30, %v1220_v26 }
 0x268   :  { %v1377_v37 = vsel %vm1163_vm0, %v1299_v32, 0.0 }
 0x269   :  { %v1378_v39 = vadd.f32 %v1377_v37, %v1376_v33  ;;  %v1084_v40 = vpop.f32.mrb[60].mxu1 }
 0x26a   :  { %v2249_v44 = vpop.f32.mrb[61].mxu1  ;;  %v3027_v47 = vadd.f32 %v1084_v40, %v2808_v58 }
 0x26b   :  { %v1087_v45 = vpop.f32.mrb[62].mxu1 }
 0x26c   :  { %v2250_v48 = vpop.f32.mrb[63].mxu1  ;;  %v1300_v53 = vmul.f32 %v3027_v47, %v3027_v47  ;;  %v3038_v55 = vadd.f32 %v1087_v45, %v2808_v58  ;;  %v1223_v61 = vsel %vm1163_vm0, %v3027_v47, 0.0 }
 0x26d   :  { %v1224_v7 = vadd.f32 %v1223_v61, %v1222_v36 }
 0x26e   :  { %v1379_v1 = vsel %vm1163_vm0, %v1300_v53, 0.0  ;;  %v1301_v2 = vmul.f32 %v3038_v55, %v3038_v55  ;;  %v1225_v8 = vsel %vm1163_vm0, %v3038_v55, 0.0 }
 0x26f   :  { %v1380_v14 = vadd.f32 %v1379_v1, %v1378_v39  ;;  %v1226_v23 = vadd.f32 %v1225_v8, %v1224_v7 }
 0x270   :  { %v1381_v17 = vsel %vm1163_vm0, %v1301_v2, 0.0 }
 0x271   :  { %v1092_v34 = vpop.f32.mrb[64].mxu1  ;;  %v1382_v30 = vadd.f32 %v1381_v17, %v1380_v14 }
 0x272   :  { %v3043_v62 = vadd.f32 %v1092_v34, %v2808_v58  ;;  %v2253_v0 = vpop.f32.mrb[65].mxu1 }
 0x273   :  { %v1095_v15 = vpop.f32.mrb[66].mxu1 }
 0x274   :  { %v2254_v4 = vpop.f32.mrb[67].mxu1  ;;  %v1302_v9 = vmul.f32 %v3043_v62, %v3043_v62  ;;  %v3053_v10 = vadd.f32 %v1095_v15, %v2808_v58  ;;  %v1227_v19 = vsel %vm1163_vm0, %v3043_v62, 0.0 }
 0x275   :  { %v1228_v32 = vadd.f32 %v1227_v19, %v1226_v23  ;;  %v2400_v19 = vld [vmem:[%s3422_s3 + $0x50] sm:$0xff]  }
 0x276   :  { %v1383_v25 = vsel %vm1163_vm0, %v1302_v9, 0.0  ;;  %v1303_v26 = vmul.f32 %v3053_v10, %v3053_v10  ;;  %v1229_v36 = vsel %vm1163_vm0, %v3053_v10, 0.0  ;;  %v2401_v23 = vld [vmem:[%s3422_s3 + $0x10] sm:$0xff]   ;;  %2153 = vmatprep.subr.bf16.mxu1 %v2400_v19 }
 0x277   :  { %v1384_v40 = vadd.f32 %v1383_v25, %v1382_v30  ;;  %v1230_v45 = vadd.f32 %v1229_v36, %v1228_v32  ;;  %2154 = vmatpush3.bf16.msra.mxu1 %v2401_v23 }
 0x278   :  { %v1385_v43 = vsel %vm1163_vm0, %v1303_v26, 0.0 }
 0x279   :  { %v1100_v24 = vpop.f32.mrb[68].mxu1  ;;  %v1386_v52 = vadd.f32 %v1385_v43, %v1384_v40 }
 0x27a   :  { %v3062_v27 = vadd.f32 %v1100_v24, %v2808_v58  ;;  %v2257_v28 = vpop.f32.mrb[69].mxu1 }
 0x27b   :  { %v1103_v33 = vpop.f32.mrb[70].mxu1 }
 0x27c   :  { %v1304_v37 = vmul.f32 %v3062_v27, %v3062_v27  ;;  %v3069_v38 = vadd.f32 %v1103_v33, %v2808_v58  ;;  %v2258_v39 = vpop.f32.mrb[71].mxu1  ;;  %v1231_v44 = vsel %vm1163_vm0, %v3062_v27, 0.0 }
 0x27d   :  { %v1232_v53 = vadd.f32 %v1231_v44, %v1230_v45 }
 0x27e   :  { %v1387_v48 = vsel %vm1163_vm0, %v1304_v37, 0.0  ;;  %v1305_v50 = vmul.f32 %v3069_v38, %v3069_v38  ;;  %v1233_v61 = vsel %vm1163_vm0, %v3069_v38, 0.0 }
 0x27f   :  { %v1388_v1 = vadd.f32 %v1387_v48, %v1386_v52  ;;  %v1234_v17 = vadd.f32 %v1233_v61, %v1232_v53 }
 0x280   :  { %v1389_v4 = vsel %vm1163_vm0, %v1305_v50, 0.0 }
 0x281   :  { %v1108_v34 = vpop.f32.mrb[72].mxu1  ;;  %v1390_v26 = vadd.f32 %v1389_v4, %v1388_v1 }
 0x282   :  { %v3080_v0 = vadd.f32 %v1108_v34, %v2808_v58  ;;  %v2261_v15 = vpop.f32.mrb[73].mxu1 }
 0x283   :  { %v1111_v2 = vpop.f32.mrb[74].mxu1 }
 0x284   :  { %v1235_v7 = vsel %vm1163_vm0, %v3080_v0, 0.0  ;;  %v1306_v8 = vmul.f32 %v3080_v0, %v3080_v0  ;;  %v3088_v9 = vadd.f32 %v1111_v2, %v2808_v58  ;;  %v2262_v14 = vpop.f32.mrb[75].mxu1 }
 0x285   :  { %v1236_v28 = vadd.f32 %v1235_v7, %v1234_v17 }
 0x286   :  { %v1391_v24 = vsel %vm1163_vm0, %v1306_v8, 0.0  ;;  %v1307_v25 = vmul.f32 %v3088_v9, %v3088_v9  ;;  %v1237_v30 = vsel %vm1163_vm0, %v3088_v9, 0.0 }
 0x287   :  { %v1392_v32 = vadd.f32 %v1391_v24, %v1390_v26  ;;  %v1238_v40 = vadd.f32 %v1237_v30, %v1236_v28 }
 0x288   :  { %v1393_v36 = vsel %vm1163_vm0, %v1307_v25, 0.0 }
 0x289   :  { %v1116_v33 = vpop.f32.mrb[76].mxu1  ;;  %v1394_v53 = vadd.f32 %v1393_v36, %v1392_v32 }
 0x28a   :  { %v1117_v37 = vadd.f32 %v1116_v33, %v2808_v58  ;;  %v2265_v39 = vpop.f32.mrb[77].mxu1 }
 0x28b   :  { %v1119_v43 = vpop.f32.mrb[78].mxu1 }
 0x28c   :  { %v1239_v44 = vsel %vm1163_vm0, %v1117_v37, 0.0  ;;  %v1308_v45 = vmul.f32 %v1117_v37, %v1117_v37  ;;  %v1120_v48 = vadd.f32 %v1119_v43, %v2808_v58  ;;  %v2266_v50 = vpop.f32.mrb[79].mxu1 }
 0x28d   :  { %v1240_v52 = vadd.f32 %v1239_v44, %v1238_v40 }
 0x28e   :  { %v1395_v34 = vsel %vm1163_vm0, %v1308_v45, 0.0  ;;  %v1241_v61 = vsel %vm1163_vm0, %v1120_v48, 0.0  ;;  %v1309_v15 = vmul.f32 %v1120_v48, %v1120_v48 }
 0x28f   :  { %v1396_v1 = vadd.f32 %v1395_v34, %v1394_v53  ;;  %v1242_v2 = vadd.f32 %v1241_v61, %v1240_v52 }
 0x290   :  { %v1397_v4 = vsel %vm1163_vm0, %v1309_v15, 0.0  ;;  %v2402_v15 = vld [vmem:[%s3422_s3 + $0x58] sm:$0xff]  }
 0x291   :  { %v1398_v7 = vadd.f32 %v1397_v4, %v1396_v1  ;;  %v1124_v8 = vpop.f32.mrb[80].mxu1  ;;  %v2403_v1 = vld [vmem:[%s3422_s3 + $0x18] sm:$0xff]   ;;  %2155 = vmatprep.subr.bf16.mxu1 %v2402_v15 }
 0x292   :  { %v1125_v14 = vadd.f32 %v1124_v8, %v2808_v58  ;;  %v2269_v17 = vpop.f32.mrb[81].mxu1  ;;  %2156 = vmatpush3.bf16.msra.mxu1 %v2403_v1 }
 0x293   :  { %v1127_v19 = vpop.f32.mrb[82].mxu1 }
 0x294   :  { %v1243_v23 = vsel %vm1163_vm0, %v1125_v14, 0.0  ;;  %v1310_v24 = vmul.f32 %v1125_v14, %v1125_v14  ;;  %v1128_v25 = vadd.f32 %v1127_v19, %v2808_v58  ;;  %v2270_v26 = vpop.f32.mrb[83].mxu1 }
 0x295   :  { %v1244_v28 = vadd.f32 %v1243_v23, %v1242_v2  ;;  %v2406_v26 = vld [vmem:[%s3422_s3 + $0x68] sm:$0xff]  }
 0x296   :  { %v1399_v30 = vsel %vm1163_vm0, %v1310_v24, 0.0  ;;  %v1245_v32 = vsel %vm1163_vm0, %v1128_v25, 0.0  ;;  %v1311_v33 = vmul.f32 %v1128_v25, %v1128_v25  ;;  %v2404_v24 = vld [vmem:[%s3422_s3 + $0x60] sm:$0xff]  }
 0x297   :  { %v1400_v36 = vadd.f32 %v1399_v30, %v1398_v7  ;;  %v1246_v37 = vadd.f32 %v1245_v32, %v1244_v28  ;;  %v2405_v25 = vld [vmem:[%s3422_s3 + $0x20] sm:$0xff]   ;;  %2157 = vmatprep.subr.bf16.mxu1 %v2404_v24 }
 0x298   :  { %v1401_v39 = vsel %vm1163_vm0, %v1311_v33, 0.0  ;;  %2158 = vmatpush3.bf16.msra.mxu1 %v2405_v25 }
 0x299   :  { %v1402_v40 = vadd.f32 %v1401_v39, %v1400_v36  ;;  %v1132_v43 = vpop.f32.mrb[84].mxu1  ;;  %2159 = vmatprep.subr.bf16.mxu1 %v2406_v26 }
 0x29a   :  { %v1133_v44 = vadd.f32 %v1132_v43, %v2808_v58  ;;  %v2273_v45 = vpop.f32.mrb[85].mxu1 }
 0x29b   :  { %v1135_v48 = vpop.f32.mrb[86].mxu1 }
 0x29c   :  { %v1247_v50 = vsel %vm1163_vm0, %v1133_v44, 0.0  ;;  %v1312_v52 = vmul.f32 %v1133_v44, %v1133_v44  ;;  %v1136_v53 = vadd.f32 %v1135_v48, %v2808_v58  ;;  %v2274_v34 = vpop.f32.mrb[87].mxu1 }
 0x29d   :  { %v1248_v61 = vadd.f32 %v1247_v50, %v1246_v37 }
 0x29e   :  { %v1403_v2 = vsel %vm1163_vm0, %v1312_v52, 0.0  ;;  %v1249_v4 = vsel %vm1163_vm0, %v1136_v53, 0.0  ;;  %v1313_v7 = vmul.f32 %v1136_v53, %v1136_v53 }
 0x29f   :  { %v1404_v8 = vadd.f32 %v1403_v2, %v1402_v40  ;;  %v1250_v14 = vadd.f32 %v1249_v4, %v1248_v61  ;;  %v2407_v40 = vld [vmem:[%s3422_s3 + $0x28] sm:$0xff]  }
 0x2a0   :  { %v1405_v17 = vsel %vm1163_vm0, %v1313_v7, 0.0  ;;  %2160 = vmatpush3.bf16.msra.mxu1 %v2407_v40 }
 0x2a1   :  { %v1406_v19 = vadd.f32 %v1405_v17, %v1404_v8  ;;  %v1140_v23 = vpop.f32.mrb[88].mxu1 }
 0x2a2   :  { %v1141_v28 = vadd.f32 %v1140_v23, %v2808_v58  ;;  %v2277_v30 = vpop.f32.mrb[89].mxu1 }
 0x2a3   :  { %v1143_v32 = vpop.f32.mrb[90].mxu1 }
 0x2a4   :  { %v1251_v33 = vsel %vm1163_vm0, %v1141_v28, 0.0  ;;  %v1314_v36 = vmul.f32 %v1141_v28, %v1141_v28  ;;  %v1144_v37 = vadd.f32 %v1143_v32, %v2808_v58  ;;  %v2278_v39 = vpop.f32.mrb[91].mxu1 }
 0x2a5   :  { %v1252_v43 = vadd.f32 %v1251_v33, %v1250_v14 }
 0x2a6   :  { %v1407_v44 = vsel %vm1163_vm0, %v1314_v36, 0.0  ;;  %v1253_v45 = vsel %vm1163_vm0, %v1144_v37, 0.0  ;;  %v1315_v48 = vmul.f32 %v1144_v37, %v1144_v37 }
 0x2a7   :  { %v1408_v50 = vadd.f32 %v1407_v44, %v1406_v19  ;;  %v1254_v52 = vadd.f32 %v1253_v45, %v1252_v43 }
 0x2a8   :  { %v1409_v53 = vsel %vm1163_vm0, %v1315_v48, 0.0 }
 0x2a9   :  { %v1410_v34 = vadd.f32 %v1409_v53, %v1408_v50  ;;  %v1148_v61 = vpop.f32.mrb[92].mxu1 }
 0x2aa   :  { %v1149_v15 = vadd.f32 %v1148_v61, %v2808_v58  ;;  %v2281_v1 = vpop.f32.mrb[93].mxu1 }
 0x2ab   :  { %v1151_v2 = vpop.f32.mrb[94].mxu1 }
 0x2ac   :  { %v1255_v4 = vsel %vm1163_vm0, %v1149_v15, 0.0  ;;  %v1316_v7 = vmul.f32 %v1149_v15, %v1149_v15  ;;  %v1152_v8 = vadd.f32 %v1151_v2, %v2808_v58  ;;  %v2282_v14 = vpop.f32.mrb[95].mxu1 }
 0x2ad   :  { %v1256_v17 = vadd.f32 %v1255_v4, %v1254_v52 }
 0x2ae   :  { %v1411_v23 = vsel %vm1163_vm0, %v1316_v7, 0.0  ;;  %v1257_v19 = vsel %vm1163_vm0, %v1152_v8, 0.0  ;;  %v1317_v24 = vmul.f32 %v1152_v8, %v1152_v8 }
 0x2af   :  { %v1412_v25 = vadd.f32 %v1411_v23, %v1410_v34  ;;  %v1258_v26 = vadd.f32 %v1257_v19, %v1256_v17 }
 0x2b0   :  { %v1413_v28 = vsel %vm1163_vm0, %v1317_v24, 0.0 }
 0x2b1   :  { %v1414_v30 = vadd.f32 %v1413_v28, %v1412_v25  ;;  %v1156_v32 = vpop.f32.mrb[96].mxu1 }
 0x2b2   :  { %v1157_v33 = vadd.f32 %v1156_v32, %v2808_v58  ;;  %v2285_v36 = vpop.f32.mrb[97].mxu1 }
 0x2b3   :  { %v1159_v37 = vpop.f32.mrb[98].mxu1 }
 0x2b4   :  { %v1259_v39 = vsel %vm1163_vm0, %v1157_v33, 0.0  ;;  %v1318_v40 = vmul.f32 %v1157_v33, %v1157_v33  ;;  %v1160_v43 = vadd.f32 %v1159_v37, %v2808_v58  ;;  %v2286_v44 = vpop.f32.mrb[99].mxu1 }
 0x2b5   :  { %v1260_v45 = vadd.f32 %v1259_v39, %v1258_v26  ;;  %v3159_v39 = vld [vmem:[%s3421_s4] sm:$0xff]  ;;  %v1439_v44 = vsub.s32 2, %v2697_v13 }
 0x2b6   :  { %v1415_v48 = vsel %vm1163_vm0, %v1318_v40, 0.0  ;;  %v1261_v50 = vsel %vm1163_vm0, %v1160_v43, 0.0  ;;  %v1319_v52 = vmul.f32 %v1160_v43, %v1160_v43 }
 0x2b7   :  { %v1416_v53 = vadd.f32 %v1415_v48, %v1414_v30  ;;  %v1262_v34 = vadd.f32 %v1261_v50, %v1260_v45  ;;  %v1475_v48 = vsub.s32 3, %v2697_v13 }
 0x2b8   :  { %v1417_v61 = vsel %vm1163_vm0, %v1319_v52, 0.0 }
 0x2b9   :  { %v1263_v15 = vrot.slane %v1262_v34, 4  ;;  %v1418_v1 = vadd.f32 %v1417_v61, %v1416_v53 }
 0x2bb   :  { %v1264_v2 = vadd.f32 %v1263_v15, %v1262_v34  ;;  %v1419_v4 = vrot.slane %v1418_v1, 4 }
 0x2bd   :  { %v1265_v7 = vrot.slane %v1264_v2, 2  ;;  %v1420_v8 = vadd.f32 %v1419_v4, %v1418_v1 }
 0x2bf   :  { %v1266_v14 = vadd.f32 %v1265_v7, %v1264_v2  ;;  %v1421_v17 = vrot.slane %v1420_v8, 2 }
 0x2c1   :  { %v1267_v58 = vrot.slane %v1266_v14, 1  ;;  %v1422_v23 = vadd.f32 %v1421_v17, %v1420_v8  ;;  %v2408_v17 = vld [vmem:[%s3422_s3 + $0x70] sm:$0xff]  }
 0x2c2   :  { %2161 = vmatprep.subr.bf16.mxu1 %v2408_v17 }
 0x2c3   :  { %v1268_v19 = vadd.f32 %v1267_v58, %v1266_v14  ;;  %v1423_v24 = vrot.slane %v1422_v23, 1 }
 0x2c5   :  { %v1269_v25 = vmul.f32 0.0025, %v1268_v19  ;;  %v1424_v26 = vadd.f32 %v1423_v24, %v1422_v23 }
 0x2c7   :  { %v1425_v28 = vmul.f32 0.0025, %v1424_v26  ;;  %v1426_v32 = vmul.f32 %v1269_v25, %v1269_v25 }
 0x2c9   :  { %v1427_v30 = vsub.f32 %v1425_v28, %v1426_v32 }
 0x2cb   :  { %v1428_v33 = vmax.f32 %v1427_v30, 0.0 }
 0x2cd   :  { %v1429_v36 = vadd.f32 1e-05, %v1428_v33 }
 0x2cf   :  { %2412 = vrsqrt.f32 %v1429_v36 }
 0x2d9   :  { %v2413_v37 = vpop.eup %2412 }
 0x2da   :  { %v1431_v40 = vmul.f32 %v3159_v39, %v2413_v37  ;;  %v2409_v37 = vld [vmem:[%s3422_s3 + $0x30] sm:$0xff]  }
 0x2db   :  { %2162 = vmatpush3.bf16.msra.mxu1 %v2409_v37 }
 0x2dc   :  { %v1432_v43 = vmul.f32 %v1431_v40, %v1269_v25  ;;  %v3165_v52 = vrot.slane %v1431_v40, %v1439_v44 }
 0x2de   :  { %v1434_v45 = vrot.slane %v1432_v43, 7  ;;  %v1441_v34 = vmul.f32 %v3165_v52, %v2814_v59  ;;  %v1442_v61 = vmul.f32 %v3165_v52, %v2811_v16  ;;  %v1443_v15 = vmul.f32 %v3165_v52, %v2817_v60 }
 0x2df   :  { %v1444_v1 = vmul.f32 %v3165_v52, %v2828_v3  ;;  %v1445_v2 = vmul.f32 %v3165_v52, %v2840_v12  ;;  %v1457_v4 = vmul.f32 %v3165_v52, %v2951_v51  ;;  %v1458_v7 = vmul.f32 %v3165_v52, %v2956_v54 }
 0x2e0   :  { %v1436_v50 = vsub.f32 %v3159_v39, %v1434_v45  ;;  %v1459_v59 = vmul.f32 %v3165_v52, %v2961_v57  ;;  %v1460_v16 = vmul.f32 %v3165_v52, %v2971_v5  ;;  %v1461_v60 = vmul.f32 %v3165_v52, %v2980_v20 }
 0x2e1   :  { %v1462_v3 = vmul.f32 %v3165_v52, %v2987_v29  ;;  %v1446_v26 = vmul.f32 %v3165_v52, %v2847_v22  ;;  %v1463_v32 = vmul.f32 %v3165_v52, %v2998_v46  ;;  %v1464_v30 = vmul.f32 %v3165_v52, %v3006_v56 }
 0x2e2   :  { %v3167_v53 = vrot.slane %v1436_v50, %v1475_v48  ;;  %v1447_v40 = vmul.f32 %v3165_v52, %v2858_v35  ;;  %v1448_v22 = vmul.f32 %v3165_v52, %v2866_v42 }
 0x2e4   :  { %v3192_v12 = vadd.f32 %v3167_v53, %v1441_v34  ;;  %v3195_v51 = vadd.f32 %v3167_v53, %v1442_v61  ;;  %v3198_v54 = vadd.f32 %v3167_v53, %v1457_v4  ;;  %v3201_v57 = vadd.f32 %v3167_v53, %v1458_v7 }
 0x2e5   :  { %v1495_v5 = vadd.f32 %v3167_v53, %v1459_v59  ;;  %v1479_v8 = vadd.f32 %v3167_v53, %v1443_v15  ;;  %v1496_v20 = vadd.f32 %v3167_v53, %v1460_v16  ;;  %v1480_v29 = vadd.f32 %v3167_v53, %v1444_v1 }
 0x2e6   :  { %v1497_v14 = vadd.f32 %v3167_v53, %v1461_v60  ;;  %v1498_v23 = vadd.f32 %v3167_v53, %v1462_v3  ;;  %v1481_v19 = vadd.f32 %v3167_v53, %v1445_v2  ;;  %v1482_v43 = vadd.f32 %v3167_v53, %v1446_v26 }
 0x2e7   :  { %vm1527_vm6 = vcmp.gt.f32.partialorder %v1495_v5, 0.0  ;;  %v1559_v58 = vmul.f32 0.2, %v1495_v5  ;;  %vm1511_vm7 = vcmp.gt.f32.partialorder %v1479_v8, 0.0  ;;  %v1543_v24 = vmul.f32 0.2, %v1479_v8 }
 0x2e8   :  { %v1560_v25 = vmul.f32 0.2, %v1496_v20  ;;  %vm1528_vm8 = vcmp.gt.f32.partialorder %v1496_v20, 0.0  ;;  %v1544_v36 = vmul.f32 0.2, %v1480_v29  ;;  %vm1512_vm9 = vcmp.gt.f32.partialorder %v1480_v29, 0.0 }
 0x2e9   :  { %v1591_v28 = vsel %vm1527_vm6, %v1495_v5, %v1559_v58  ;;  %v1575_v33 = vsel %vm1511_vm7, %v1479_v8, %v1543_v24  ;;  %v1499_v56 = vadd.f32 %v3167_v53, %v1463_v32  ;;  %v1500_v44 = vadd.f32 %v3167_v53, %v1464_v30 }
 0x2ea   :  { %1688 = vrot.lane.b32.xlu0 %v1591_v28, %s2428_s10  ;;  %1609 = vrot.lane.b32.xlu1 %v1575_v33, %s2428_s10  ;;  %v1592_v46 = vsel %vm1528_vm8, %v1496_v20, %v1560_v25  ;;  %v1561_v45 = vmul.f32 0.2, %v1497_v14  ;;  %v1562_v48 = vmul.f32 0.2, %v1498_v23  ;;  %v3230_v50 = vadd.f32 %v3167_v53, %v1447_v40 }
 0x2eb   :  { %v3233_v35 = vadd.f32 %v3167_v53, %v1448_v22  ;;  %v1576_v42 = vsel %vm1512_vm9, %v1480_v29, %v1544_v36  ;;  %vm1529_vm10 = vcmp.gt.f32.partialorder %v1497_v14, 0.0  ;;  %vm1530_vm11 = vcmp.gt.f32.partialorder %v1498_v23, 0.0 }
 0x2ec   :  { %v1449_v34 = vmul.f32 %v3165_v52, %v2881_v11  ;;  %v1465_v61 = vmul.f32 %v3165_v52, %v3027_v47  ;;  %v1466_v15 = vmul.f32 %v3165_v52, %v3038_v55  ;;  %v1450_v1 = vmul.f32 %v3165_v52, %v2886_v18 }
 0x2ed   :  { %v1467_v2 = vmul.f32 %v3165_v52, %v3043_v62  ;;  %vm1513_vm12 = vcmp.gt.f32.partialorder %v1481_v19, 0.0  ;;  %v1545_v4 = vmul.f32 0.2, %v1481_v19  ;;  %v1593_v7 = vsel %vm1529_vm10, %v1497_v14, %v1561_v45 }
 0x2ee   :  { %1690 = vrot.lane.b32.xlu0 %v1592_v46, %s2428_s10  ;;  %1611 = vrot.lane.b32.xlu1 %v1576_v42, %s2428_s10  ;;  %v1594_v59 = vsel %vm1530_vm11, %v1498_v23, %v1562_v48  ;;  %v1501_v16 = vadd.f32 %v3167_v53, %v1465_v61  ;;  %v3247_v11 = vadd.f32 %v3167_v53, %v1466_v15  ;;  %v1546_v47 = vmul.f32 0.2, %v1482_v43  ;;  %v2411_v61 = vld [vmem:[%s3422_s3 + $0x38] sm:$0xff]  }
 0x2ef   :  { %v3250_v55 = vadd.f32 %v3167_v53, %v1449_v34  ;;  %v3253_v18 = vadd.f32 %v3167_v53, %v1450_v1  ;;  %v3256_v62 = vadd.f32 %v3167_v53, %v1467_v2  ;;  %vm1514_vm13 = vcmp.gt.f32.partialorder %v1482_v43, 0.0  ;;  %v2410_v34 = vld [vmem:[%s3422_s3 + $0x78] sm:$0xff]   ;;  %s2432_s3 = smov 80  }
 0x2f0   :  { %v1451_v60 = vmul.f32 %v3165_v52, %v2891_v21  ;;  %v1452_v3 = vmul.f32 %v3165_v52, %v2901_v31  ;;  %v1468_v5 = vmul.f32 %v3165_v52, %v3053_v10  ;;  %v1469_v8 = vmul.f32 %v3165_v52, %v3062_v27  ;;  %2163 = vmatprep.subr.bf16.mxu1 %v2410_v34 }
 0x2f1   :  { %v1470_v20 = vmul.f32 %v3165_v52, %v3069_v38  ;;  %v1577_v29 = vsel %vm1513_vm12, %v1481_v19, %v1545_v4  ;;  %vm1531_vm14 = vcmp.gt.f32.partialorder %v1499_v56, 0.0  ;;  %v1563_v14 = vmul.f32 0.2, %v1499_v56  ;;  %2164 = vmatpush3.bf16.msra.mxu1 %v2411_v61 }
 0x2f2   :  { %1698 = vrot.lane.b32.xlu0 %v1593_v7, %s2429_s12  ;;  %1700 = vrot.lane.b32.xlu1 %v1594_v59, %s2429_s12  ;;  %v1578_v17 = vsel %vm1514_vm13, %v1482_v43, %v1546_v47  ;;  %v1564_v58 = vmul.f32 0.2, %v1500_v44  ;;  %v3270_v21 = vadd.f32 %v3167_v53, %v1468_v5  ;;  %v3273_v31 = vadd.f32 %v3167_v53, %v1451_v60 }
 0x2f3   :  { %vm1532_vm15 = vcmp.gt.f32.partialorder %v1500_v44, 0.0  ;;  %v3276_v10 = vadd.f32 %v3167_v53, %v1452_v3  ;;  %v3279_v27 = vadd.f32 %v3167_v53, %v1469_v8  ;;  %v3282_v38 = vadd.f32 %v3167_v53, %v1470_v20 }
 0x2f4   :  { %v1453_v23 = vmul.f32 %v3165_v52, %v2910_v41  ;;  %v1454_v19 = vmul.f32 %v3165_v52, %v2917_v49  ;;  %v1455_v24 = vmul.f32 %v3165_v52, %v2928_v63  ;;  %v1471_v25 = vmul.f32 %v3165_v52, %v3080_v0 }
 0x2f5   :  { %v1595_v26 = vsel %vm1531_vm14, %v1499_v56, %v1563_v14  ;;  %v1547_v28 = vmul.f32 0.2, %v3230_v50  ;;  %v1472_v32 = vmul.f32 %v3165_v52, %v3088_v9  ;;  %v1596_v30 = vsel %vm1532_vm15, %v1500_v44, %v1564_v58 }
 0x2f6   :  { %1620 = vrot.lane.b32.xlu0 %v1577_v29, %s2429_s12  ;;  %1622 = vrot.lane.b32.xlu1 %v1578_v17, %s2429_s12  ;;  %vm1515_vm1 = vcmp.gt.f32.partialorder %v3230_v50, 0.0  ;;  %v1548_v41 = vmul.f32 0.2, %v3233_v35  ;;  %vm1516_vm2 = vcmp.gt.f32.partialorder %v3233_v35, 0.0  ;;  %v3300_v49 = vadd.f32 %v3167_v53, %v1453_v23 }
 0x2f7   :  { %v3303_v63 = vadd.f32 %v3167_v53, %v1454_v19  ;;  %v3306_v0 = vadd.f32 %v3167_v53, %v1471_v25  ;;  %v3309_v9 = vadd.f32 %v3167_v53, %v1472_v32  ;;  %v3312_v33 = vadd.f32 %v3167_v53, %v1455_v24 }
 0x2f8   :  { %v1579_v36 = vsel %vm1515_vm1, %v3230_v50, %v1547_v28  ;;  %v1565_v37 = vmul.f32 0.2, %v1501_v16  ;;  %v1456_v40 = vmul.f32 %v3165_v52, %v2936_v6  ;;  %v1580_v22 = vsel %vm1516_vm2, %v3233_v35, %v1548_v41 }
 0x2f9   :  { %vm1533_vm3 = vcmp.gt.f32.partialorder %v1501_v16, 0.0  ;;  %v1566_v46 = vmul.f32 0.2, %v3247_v11  ;;  %vm1534_vm4 = vcmp.gt.f32.partialorder %v3247_v11, 0.0  ;;  %vm1517_vm5 = vcmp.gt.f32.partialorder %v3250_v55, 0.0 }
 0x2fa   :  { %1708 = vrot.lane.b32.xlu0 %v1595_v26, %s2430_s13  ;;  %1710 = vrot.lane.b32.xlu1 %v1596_v30, %s2430_s13  ;;  %v1549_v43 = vmul.f32 0.2, %v3250_v55  ;;  %vm1518_vm6 = vcmp.gt.f32.partialorder %v3253_v18, 0.0  ;;  %v3324_v56 = vadd.f32 %v3167_v53, %v1456_v40  ;;  %vm1525_vm7 = vcmp.gt.f32.partialorder %v3198_v54, 0.0 }
 0x2fb   :  { %v1597_v6 = vsel %vm1533_vm3, %v1501_v16, %v1565_v37  ;;  %v1557_v52 = vmul.f32 0.2, %v3198_v54  ;;  %vm1509_vm8 = vcmp.gt.f32.partialorder %v3192_v12, 0.0  ;;  %v1541_v44 = vmul.f32 0.2, %v3192_v12 }
 0x2fc   :  { %v1598_v45 = vsel %vm1534_vm4, %v3247_v11, %v1566_v46  ;;  %v1550_v48 = vmul.f32 0.2, %v3253_v18  ;;  %vm1526_vm9 = vcmp.gt.f32.partialorder %v3201_v57, 0.0  ;;  %v1558_v53 = vmul.f32 0.2, %v3201_v57 }
 0x2fd   :  { %v1589_v50 = vsel %vm1525_vm7, %v3198_v54, %v1557_v52  ;;  %v1573_v35 = vsel %vm1509_vm8, %v3192_v12, %v1541_v44  ;;  %vm1510_vm10 = vcmp.gt.f32.partialorder %v3195_v51, 0.0  ;;  %v1542_v42 = vmul.f32 0.2, %v3195_v51 }
 0x2fe   :  { %1631 = vrot.lane.b32.xlu0 %v1579_v36, %s2430_s13  ;;  %1633 = vrot.lane.b32.xlu1 %v1580_v22, %s2430_s13  ;;  %1684 = vst.msk [vmem:[#allocation2 + $0x8] sm:$0xff] %vm1163_vm0, %v1589_v50  ;;  %1605 = vst.msk [vmem:[#allocation2] sm:$0xff] %vm1163_vm0, %v1573_v35  ;;  %v1590_v54 = vsel %vm1526_vm9, %v3201_v57, %v1558_v53  ;;  %v1581_v12 = vsel %vm1517_vm5, %v3250_v55, %v1549_v43  ;;  %v1567_v15 = vmul.f32 0.2, %v3256_v62  ;;  %vm1615_vm7 = vcmask 261248  }
 0x2ff   :  { %1685 = vst.msk [vmem:[#allocation2 + $0x18] sm:$0xff] %vm1163_vm0, %v1590_v54  ;;  %v1574_v1 = vsel %vm1510_vm10, %v3195_v51, %v1542_v42  ;;  %v1582_v2 = vsel %vm1518_vm6, %v3253_v18, %v1550_v48  ;;  %vm1535_vm11 = vcmp.gt.f32.partialorder %v3256_v62, 0.0  ;;  %v1568_v57 = vmul.f32 0.2, %v3270_v21 }
 0x300   :  { %1606 = vst.msk [vmem:[#allocation2 + $0x10] sm:$0xff] %vm1163_vm0, %v1574_v1  ;;  %vm1536_vm12 = vcmp.gt.f32.partialorder %v3270_v21, 0.0  ;;  %v1599_v4 = vsel %vm1535_vm11, %v3256_v62, %v1567_v15  ;;  %v1551_v51 = vmul.f32 0.2, %v3273_v31  ;;  %vm1519_vm13 = vcmp.gt.f32.partialorder %v3273_v31, 0.0 }
 0x301   :  { %v1600_v7 = vsel %vm1536_vm12, %v3270_v21, %v1568_v57  ;;  %v1552_v59 = vmul.f32 0.2, %v3276_v10  ;;  %vm1520_vm14 = vcmp.gt.f32.partialorder %v3276_v10, 0.0  ;;  %v1569_v11 = vmul.f32 0.2, %v3279_v27 }
 0x302   :  { %1718 = vrot.lane.b32.xlu0 %v1597_v6, %s2431_s14  ;;  %1720 = vrot.lane.b32.xlu1 %v1598_v45, %s2431_s14  ;;  %v1583_v16 = vsel %vm1519_vm13, %v3273_v31, %v1551_v51  ;;  %vm1537_vm0 = vcmp.gt.f32.partialorder %v3279_v27, 0.0  ;;  %v1570_v55 = vmul.f32 0.2, %v3282_v38  ;;  %vm1538_vm15 = vcmp.gt.f32.partialorder %v3282_v38, 0.0 }
 0x303   :  { %v1584_v47 = vsel %vm1520_vm14, %v3276_v10, %v1552_v59  ;;  %v1601_v18 = vsel %vm1537_vm0, %v3279_v27, %v1569_v11  ;;  %v1553_v62 = vmul.f32 0.2, %v3300_v49  ;;  %vm1521_vm1 = vcmp.gt.f32.partialorder %v3300_v49, 0.0 }
 0x304   :  { %v1602_v60 = vsel %vm1538_vm15, %v3282_v38, %v1570_v55  ;;  %v1554_v3 = vmul.f32 0.2, %v3303_v63  ;;  %vm1522_vm2 = vcmp.gt.f32.partialorder %v3303_v63, 0.0  ;;  %v1571_v8 = vmul.f32 0.2, %v3306_v0 }
 0x305   :  { %v1585_v5 = vsel %vm1521_vm1, %v3300_v49, %v1553_v62  ;;  %vm1539_vm3 = vcmp.gt.f32.partialorder %v3306_v0, 0.0  ;;  %v1572_v29 = vmul.f32 0.2, %v3309_v9  ;;  %vm1540_vm4 = vcmp.gt.f32.partialorder %v3309_v9, 0.0 }
 0x306   :  { %1642 = vrot.lane.b32.xlu0 %v1581_v12, %s2431_s14  ;;  %1644 = vrot.lane.b32.xlu1 %v1582_v2, %s2431_s14  ;;  %v1586_v20 = vsel %vm1522_vm2, %v3303_v63, %v1554_v3  ;;  %v1603_v14 = vsel %vm1539_vm3, %v3306_v0, %v1571_v8  ;;  %v1555_v17 = vmul.f32 0.2, %v3312_v33  ;;  %vm1523_vm5 = vcmp.gt.f32.partialorder %v3312_v33, 0.0 }
 0x307   :  { %v1604_v58 = vsel %vm1540_vm4, %v3309_v9, %v1572_v29  ;;  %v1556_v21 = vmul.f32 0.2, %v3324_v56  ;;  %vm1524_vm6 = vcmp.gt.f32.partialorder %v3324_v56, 0.0  ;;  %vm1626_vm8 = vcmask 392448  }
 0x308   :  { %v1587_v31 = vsel %vm1523_vm5, %v3312_v33, %v1555_v17  ;;  %vm1637_vm9 = vcmask 523648   ;;  %vm1648_vm10 = vcmask 654848   ;;  %vm1659_vm11 = vcmask 786048  }
 0x309   :  { %v1588_v10 = vsel %vm1524_vm6, %v3324_v56, %v1556_v21  ;;  %vm1670_vm12 = vcmask 917248   ;;  %vm1681_vm13 = vcmask 1048448   ;;  %v1796_v54 = vsub.s32 4, %v2697_v13 }
 0x30a   :  { %1728 = vrot.lane.b32.xlu0 %v1599_v4, %s2432_s3  ;;  %1730 = vrot.lane.b32.xlu1 %v1600_v7, %s2432_s3  ;;  %vm1935_vm14 = vcmask 261120   ;;  %vm2019_vm1 = vcmask 7168  }
 0x30b   :  { %v1797_v15 = vrot.slane %v3159_v39, %v1796_v54 }
 0x30e   :  { %1653 = vrot.lane.b32.xlu0 %v1583_v16, %s2432_s3  ;;  %1655 = vrot.lane.b32.xlu1 %v1584_v47, %s2432_s3 }
 0x312   :  { %1738 = vrot.lane.b32.xlu0 %v1601_v18, %s2433_s2  ;;  %1740 = vrot.lane.b32.xlu1 %v1602_v60, %s2433_s2 }
 0x316   :  { %1664 = vrot.lane.b32.xlu0 %v1585_v5, %s2433_s2  ;;  %1666 = vrot.lane.b32.xlu1 %v1586_v20, %s2433_s2 }
 0x31a   :  { %1748 = vrot.lane.b32.xlu0 %v1603_v14, %s2434_s19  ;;  %1750 = vrot.lane.b32.xlu1 %v1604_v58, %s2434_s19 }
 0x31e   :  { %1675 = vrot.lane.b32.xlu0 %v1587_v31, %s2434_s19  ;;  %1677 = vrot.lane.b32.xlu1 %v1588_v10, %s2434_s19 }
 0x35c   :  { %v1689_v27 = vpop.permute.xlu0 %1688  ;;  %v1610_v38 = vpop.permute.xlu1 %1609 }
 0x35d   :  { %1694 = vst.msk [vmem:[#allocation2 + $0x8] sm:$0xff] %vm1615_vm7, %v1689_v27  ;;  %1616 = vst.msk [vmem:[#allocation2] sm:$0xff] %vm1615_vm7, %v1610_v38 }
 0x360   :  { %v1691_v23 = vpop.permute.xlu0 %1690  ;;  %v1612_v19 = vpop.permute.xlu1 %1611 }
 0x361   :  { %1695 = vst.msk [vmem:[#allocation2 + $0x18] sm:$0xff] %vm1615_vm7, %v1691_v23  ;;  %1617 = vst.msk [vmem:[#allocation2 + $0x10] sm:$0xff] %vm1615_vm7, %v1612_v19 }
 0x364   :  { %v1699_v24 = vpop.permute.xlu0 %1698  ;;  %v1701_v25 = vpop.permute.xlu1 %1700 }
 0x365   :  { %1704 = vst.msk [vmem:[#allocation2 + $0x8] sm:$0xff] %vm1626_vm8, %v1699_v24  ;;  %1705 = vst.msk [vmem:[#allocation2 + $0x18] sm:$0xff] %vm1626_vm8, %v1701_v25 }
 0x368   :  { %v1621_v26 = vpop.permute.xlu0 %1620  ;;  %v1623_v28 = vpop.permute.xlu1 %1622 }
 0x369   :  { %1627 = vst.msk [vmem:[#allocation2] sm:$0xff] %vm1626_vm8, %v1621_v26  ;;  %1628 = vst.msk [vmem:[#allocation2 + $0x10] sm:$0xff] %vm1626_vm8, %v1623_v28 }
 0x36c   :  { %v1709_v32 = vpop.permute.xlu0 %1708  ;;  %v1711_v30 = vpop.permute.xlu1 %1710 }
 0x36d   :  { %1714 = vst.msk [vmem:[#allocation2 + $0x8] sm:$0xff] %vm1637_vm9, %v1709_v32  ;;  %1715 = vst.msk [vmem:[#allocation2 + $0x18] sm:$0xff] %vm1637_vm9, %v1711_v30  ;;  %v1971_v32 = vsub.s32 5, %v2697_v13 }
 0x370   :  { %v1632_v41 = vpop.permute.xlu0 %1631  ;;  %v1634_v49 = vpop.permute.xlu1 %1633 }
 0x371   :  { %1638 = vst.msk [vmem:[#allocation2] sm:$0xff] %vm1637_vm9, %v1632_v41  ;;  %1639 = vst.msk [vmem:[#allocation2 + $0x10] sm:$0xff] %vm1637_vm9, %v1634_v49 }
 0x374   :  { %v1719_v63 = vpop.permute.xlu0 %1718  ;;  %v1721_v0 = vpop.permute.xlu1 %1720 }
 0x375   :  { %1724 = vst.msk [vmem:[#allocation2 + $0x8] sm:$0xff] %vm1648_vm10, %v1719_v63  ;;  %1725 = vst.msk [vmem:[#allocation2 + $0x18] sm:$0xff] %vm1648_vm10, %v1721_v0 }
 0x378   :  { %v1643_v9 = vpop.permute.xlu0 %1642  ;;  %v1645_v33 = vpop.permute.xlu1 %1644 }
 0x379   :  { %1649 = vst.msk [vmem:[#allocation2] sm:$0xff] %vm1648_vm10, %v1643_v9  ;;  %1650 = vst.msk [vmem:[#allocation2 + $0x10] sm:$0xff] %vm1648_vm10, %v1645_v33  ;;  %v1977_v33 = vsub.s32 6, %v2697_v13 }
 0x37c   :  { %v1729_v36 = vpop.permute.xlu0 %1728  ;;  %v1731_v37 = vpop.permute.xlu1 %1730 }
 0x37d   :  { %1734 = vst.msk [vmem:[#allocation2 + $0x8] sm:$0xff] %vm1659_vm11, %v1729_v36  ;;  %1735 = vst.msk [vmem:[#allocation2 + $0x18] sm:$0xff] %vm1659_vm11, %v1731_v37 }
 0x380   :  { %v1654_v40 = vpop.permute.xlu0 %1653  ;;  %v1656_v22 = vpop.permute.xlu1 %1655 }
 0x381   :  { %1660 = vst.msk [vmem:[#allocation2] sm:$0xff] %vm1659_vm11, %v1654_v40  ;;  %1661 = vst.msk [vmem:[#allocation2 + $0x10] sm:$0xff] %vm1659_vm11, %v1656_v22  ;;  %v1989_v40 = vsub.s32 7, %v2697_v13 }
 0x384   :  { %v1739_v46 = vpop.permute.xlu0 %1738  ;;  %v1741_v43 = vpop.permute.xlu1 %1740 }
 0x385   :  { %1744 = vst.msk [vmem:[#allocation2 + $0x8] sm:$0xff] %vm1670_vm12, %v1739_v46  ;;  %1745 = vst.msk [vmem:[#allocation2 + $0x18] sm:$0xff] %vm1670_vm12, %v1741_v43 }
 0x388   :  { %v1665_v56 = vpop.permute.xlu0 %1664  ;;  %v1667_v6 = vpop.permute.xlu1 %1666 }
 0x389   :  { %1671 = vst.msk [vmem:[#allocation2] sm:$0xff] %vm1670_vm12, %v1665_v56  ;;  %1672 = vst.msk [vmem:[#allocation2 + $0x10] sm:$0xff] %vm1670_vm12, %v1667_v6  ;;  %v1990_v56 = vrot.slane %v3159_v39, %v1989_v40 }
 0x38c   :  { %v1749_v52 = vpop.permute.xlu0 %1748  ;;  %v1751_v44 = vpop.permute.xlu1 %1750 }
 0x38d   :  { %1754 = vst.msk [vmem:[#allocation2 + $0x8] sm:$0xff] %vm1681_vm13, %v1749_v52  ;;  %1755 = vst.msk [vmem:[#allocation2 + $0x18] sm:$0xff] %vm1681_vm13, %v1751_v44 }
 0x390   :  { %v1676_v45 = vpop.permute.xlu0 %1675  ;;  %v1678_v48 = vpop.permute.xlu1 %1677 }
 0x391   :  { %1682 = vst.msk [vmem:[#allocation2] sm:$0xff] %vm1681_vm13, %v1676_v45  ;;  %1683 = vst.msk [vmem:[#allocation2 + $0x10] sm:$0xff] %vm1681_vm13, %v1678_v48 }
 0x394   :  { %v1757_v53 = vld [vmem:[#allocation2 + $0x8] sm:$0xff]  ;;  %v1759_v50 = vld [vmem:[#allocation2 + $0x18] sm:$0xff] }
 0x395   :  { %v1761_v35 = vpack.c.bf16 %v1759_v50, %v1757_v53 }
 0x397   :  { %1926 = vmatprep.mubr.bf16.mxu1 %v1761_v35 }
 0x398   :  { %v1756_v42 = vld [vmem:[#allocation2] sm:$0xff]  ;;  %v1758_v34 = vld [vmem:[#allocation2 + $0x10] sm:$0xff] }
 0x399   :  { %v1760_v61 = vpack.c.bf16 %v1758_v34, %v1756_v42 }
 0x39b   :  { %1927 = vmatmul.mubr.bf16.vlgmr.msra.gmra.mrb[100].mxu1 %v1760_v61 }
 0x46e   :  { %v2165_v12 = vpop.f32.mrb[100].mxu1 }
 0x46f   :  { %v2166_v1 = vpop.f32.mrb[101].mxu1 }
 0x470   :  { %v2167_v2 = vadd.f32 %v2166_v1, %v2165_v12  ;;  %v2168_v57 = vpop.f32.mrb[102].mxu1 }
 0x471   :  { %v2169_v4 = vpop.f32.mrb[103].mxu1 }
 0x472   :  { %v1929_v51 = vadd.f32 %v2167_v2, %v1797_v15  ;;  %v2170_v7 = vadd.f32 %v2169_v4, %v2168_v57 }
 0x474   :  { %v1946_v59 = vmul.f32 %v1929_v51, %v1929_v51  ;;  %v1932_v16 = vadd.f32 %v2170_v7, %v1797_v15  ;;  %v1936_v11 = vsel %vm1935_vm14, %v1929_v51, 0.0 }
 0x476   :  { %v1937_v47 = vsel %vm1935_vm14, %v1932_v16, 0.0  ;;  %v1947_v55 = vmul.f32 %v1932_v16, %v1932_v16  ;;  %v1948_v62 = vsel %vm1935_vm14, %v1946_v59, 0.0 }
 0x477   :  { %v1938_v18 = vadd.f32 %v1937_v47, %v1936_v11 }
 0x478   :  { %v1949_v60 = vsel %vm1935_vm14, %v1947_v55, 0.0 }
 0x479   :  { %v1939_v3 = vrot.slane %v1938_v18, 4  ;;  %v1950_v5 = vadd.f32 %v1949_v60, %v1948_v62 }
 0x47b   :  { %v1940_v8 = vadd.f32 %v1939_v3, %v1938_v18  ;;  %v1951_v20 = vrot.slane %v1950_v5, 4 }
 0x47d   :  { %v1941_v29 = vrot.slane %v1940_v8, 2  ;;  %v1952_v14 = vadd.f32 %v1951_v20, %v1950_v5 }
 0x47f   :  { %v1942_v17 = vadd.f32 %v1941_v29, %v1940_v8  ;;  %v1953_v58 = vrot.slane %v1952_v14, 2 }
 0x481   :  { %v1943_v21 = vrot.slane %v1942_v17, 1  ;;  %v1954_v31 = vadd.f32 %v1953_v58, %v1952_v14 }
 0x483   :  { %v1944_v10 = vadd.f32 %v1943_v21, %v1942_v17  ;;  %v1955_v27 = vrot.slane %v1954_v31, 1 }
 0x485   :  { %v1945_v38 = vmul.f32 0.0625, %v1944_v10  ;;  %v1956_v23 = vadd.f32 %v1955_v27, %v1954_v31 }
 0x487   :  { %v1957_v19 = vmul.f32 0.0625, %v1956_v23  ;;  %v1958_v24 = vmul.f32 %v1945_v38, %v1945_v38 }
 0x489   :  { %v1959_v25 = vsub.f32 %v1957_v19, %v1958_v24 }
 0x48b   :  { %v1960_v26 = vmax.f32 %v1959_v25, 0.0 }
 0x48d   :  { %v1961_v28 = vadd.f32 1e-05, %v1960_v26 }
 0x48f   :  { %2414 = vrsqrt.f32 %v1961_v28 }
 0x499   :  { %v2415_v30 = vpop.eup %2414 }
 0x49a   :  { %v1963_v41 = vmul.f32 %v3159_v39, %v2415_v30 }
 0x49c   :  { %v1964_v49 = vmul.f32 %v1963_v41, %v1945_v38  ;;  %v1972_v63 = vrot.slane %v1963_v41, %v1971_v32 }
 0x49e   :  { %v1966_v0 = vrot.slane %v1964_v49, 7  ;;  %v1974_v9 = vmul.f32 %v1972_v63, %v1932_v16  ;;  %v1973_v36 = vmul.f32 %v1972_v63, %v1929_v51 }
 0x4a0   :  { %v1968_v37 = vsub.f32 %v3159_v39, %v1966_v0 }
 0x4a2   :  { %v1978_v22 = vrot.slane %v1968_v37, %v1977_v33 }
 0x4a4   :  { %v1980_v46 = vadd.f32 %v1978_v22, %v1974_v9  ;;  %v1979_v43 = vadd.f32 %v1978_v22, %v1973_v36 }
 0x4a6   :  { %vm1982_vm0 = vcmp.gt.f32.partialorder %v1980_v46, 0.0  ;;  %v1984_v6 = vmul.f32 0.2, %v1980_v46  ;;  %vm1981_vm15 = vcmp.gt.f32.partialorder %v1979_v43, 0.0  ;;  %v1983_v52 = vmul.f32 0.2, %v1979_v43 }
 0x4a8   :  { %v1986_v44 = vsel %vm1982_vm0, %v1980_v46, %v1984_v6  ;;  %v1985_v45 = vsel %vm1981_vm15, %v1979_v43, %v1983_v52 }
 0x4a9   :  { %v1992_v48 = vmul.f32 %v1990_v56, %v1986_v44  ;;  %v1991_v53 = vmul.f32 %v1990_v56, %v1985_v45 }
 0x4ab   :  { %v1996_v50 = vsel %vm1935_vm14, %v1992_v48, 0.0  ;;  %v1993_v35 = vsel %vm1935_vm14, %v1991_v53, 0.0 }
 0x4ac   :  { %1997 = vadd.xlane.f32.xlu1 %v1996_v50  ;;  %1994 = vadd.xlane.f32.xlu0 %v1993_v35 }
 0x539   :  { %v1998_v13 = vpop.xlane.xlu1 %1997  ;;  %v1995_v42 = vpop.xlane.xlu0 %1994 }
 0x53a   :  { %v2000_v34 = vadd.f32 %v1998_v13, %v1990_v56  ;;  %v1999_v61 = vadd.f32 %v1995_v42, %v1990_v56 }
 0x53c   :  { %v2002_v54 = vsub.f32 0.0, %v2000_v34  ;;  %v2001_v39 = vsub.f32 0.0, %v1999_v61 }
 0x53e   :  { %v2005_v12 = vmul.f32 1.442695, %v2002_v54  ;;  %v2003_v15 = vmul.f32 1.442695, %v2001_v39 }
 0x540   :  { %2416 = vpow2.f32 %v2005_v12 }
 0x541   :  { %2418 = vpow2.f32 %v2003_v15 }
 0x54a   :  { %v2417_v1 = vpop.eup %2416 }
 0x54b   :  { %v2419_v2 = vpop.eup %2418  ;;  %v2008_v57 = vadd.f32 1.0, %v2417_v1 }
 0x54c   :  { %v2007_v4 = vadd.f32 1.0, %v2419_v2 }
 0x54d   :  { %2420 = vrcp.f32 %v2008_v57 }
 0x54e   :  { %2422 = vrcp.f32 %v2007_v4 }
 0x557   :  { %v2421_v51 = vpop.eup %2420 }
 0x558   :  { %v2423_v7 = vpop.eup %2422  ;;  %2015 = vrot.lane.b32.xlu1 %v2421_v51, %s2433_s2 }
 0x559   :  { %2013 = vrot.lane.b32.xlu0 %v2423_v7, %s2433_s2 }
 0x5ca   :  { %v2016_v59 = vpop.permute.xlu1 %2015 }
 0x5cb   :  { %2021 = vst.msk [vmem:[%s3423_s5 + $0x8] sm:$0xff] %vm2019_vm1, %v2016_v59  ;;  %v2014_v16 = vpop.permute.xlu0 %2013 }
 0x5cc   :  { %2020 = vst.msk [vmem:[%s3423_s5] sm:$0xff] %vm2019_vm1, %v2014_v16 }

</bundles_post_ra>
